<compile_context>
chip_gen: v6e
topology: v6e:2x2x1
jax: 0.10.0
libtpu: 0.0.40
codegen_flags: <defaults>
</compile_context>

<pallas_src>
import math
from functools import partial

import jax
import jax.numpy as jnp
from jax import lax
from jax.experimental import pallas as pl
from jax.experimental.pallas import tpu as pltpu


def _layernorm(x, w, b, eps=1e-5):
    mu = jnp.mean(x, axis=-1, keepdims=True)
    var = jnp.mean(jnp.square(x - mu), axis=-1, keepdims=True)
    return (x - mu) * lax.rsqrt(var + eps) * w + b


def block_kernel(
    x_ref,
    ln1_w_ref, ln1_b_ref,
    w_in_x_ref, w_in_z_ref,
    conv_w_ref, conv_b_ref,
    w_xp_dt_ref, w_xp_b_ref, w_xp_c_ref,
    w_dt_ref, b_dt_ref,
    A_T_ref, D_ref,
    w_out_ref,
    ln2_w_ref, ln2_b_ref,
    w1_ref, b1_ref, w2_ref, b2_ref,
    out_ref,
    xm_pad_s, dt_s, xc_s, y_s, b_s, c_s,
    *, L, d_inner, d_state, d_conv, T,
):
    f32 = jnp.float32

    x = x_ref[0]                                            # (L, D) f32

    # ---------------- ln1 ----------------
    xn = _layernorm(x, ln1_w_ref[...], ln1_b_ref[...])

    # ------- Mamba in_proj (weights pre-split in wrapper) -------
    xm = jnp.dot(xn, w_in_x_ref[...], preferred_element_type=f32)   # (L, Di)
    z = jnp.dot(xn, w_in_z_ref[...], preferred_element_type=f32)    # (L, Di)

    # ------- causal depthwise conv1d via halo scratch (no roll/where temps) ----
    halo = d_conv - 1
    if halo > 0:
        xm_pad_s[0:halo, :] = jnp.zeros((halo, d_inner), f32)
    xm_pad_s[halo:halo + L, :] = xm
    acc = jnp.zeros((L, d_inner), f32) + conv_b_ref[...]
    for k in range(d_conv):                                 # d_conv tiny, static
        acc = acc + conv_w_ref[k:k + 1, :] * xm_pad_s[k:k + L, :]
    x_conv = acc * jax.nn.sigmoid(acc)                      # SiLU, f32

    # ---------------- x_proj -> dt, B, C ----------------
    # dt low-rank dim zero-padded to 128 lanes in the wrapper (lane-dense).
    dt_lr = jnp.dot(x_conv, w_xp_dt_ref[...], preferred_element_type=f32)
    Bm = jnp.dot(x_conv, w_xp_b_ref[...], preferred_element_type=f32)   # (L, Ds)
    Cm = jnp.dot(x_conv, w_xp_c_ref[...], preferred_element_type=f32)   # (L, Ds)

    dt = jax.nn.softplus(
        jnp.dot(dt_lr, w_dt_ref[...], preferred_element_type=f32) + b_dt_ref[...])

    # Stage per-row scan operands in VMEM scratch (row-addressable with pl.ds).
    dt_s[...] = dt
    xc_s[...] = x_conv
    b_s[...] = Bm
    c_s[...] = Cm

    A_T = A_T_ref[...]                                      # (Ds, Di) = -exp(A_log).T
    # Constant (Ds, Ds) diagonal mask: turns a (1, Ds) row into a (Ds, 1)
    # column with one select + lane reduce (no transposes, O(Ds^2) per step).
    eye = (lax.broadcasted_iota(jnp.int32, (d_state, d_state), 0) ==
           lax.broadcasted_iota(jnp.int32, (d_state, d_state), 1))

    # -------- selective scan: lane-dense state, T-step unrolled blocks --------
    num_blk = L // T

    def blk_body(blk, h):
        t0 = pl.multiple_of(blk * T, T)
        dt_blk = dt_s[pl.ds(t0, T), :]                       # (T, Di) dense load
        xc_blk = xc_s[pl.ds(t0, T), :]                       # (T, Di)
        b_blk = b_s[pl.ds(t0, T), :]                         # (T, Ds)
        c_blk = c_s[pl.ds(t0, T), :]                         # (T, Ds)
        ys = []
        for k in range(T):                                   # fully unrolled
            dt_row = dt_blk[k:k + 1, :]                      # (1, Di)
            dtx_row = dt_row * xc_blk[k:k + 1, :]            # (1, Di)
            b_col = jnp.sum(jnp.where(eye, b_blk[k:k + 1, :], 0.0),
                            axis=1, keepdims=True)           # (Ds, 1)
            c_col = jnp.sum(jnp.where(eye, c_blk[k:k + 1, :], 0.0),
                            axis=1, keepdims=True)           # (Ds, 1)
            h = jnp.exp(dt_row * A_T) * h + b_col * dtx_row  # (Ds, Di)
            ys.append(jnp.sum(h * c_col, axis=0, keepdims=True))
        y_s[pl.ds(t0, T), :] = jnp.concatenate(ys, axis=0)   # dense (T, Di) store
        return h

    lax.fori_loop(0, num_blk, blk_body,
                  jnp.zeros((d_state, d_inner), f32))

    y = y_s[...] + x_conv * D_ref[...]
    y = y * (z * jax.nn.sigmoid(z))                          # gate: y * silu(z)

    mamba_out = jnp.dot(y, w_out_ref[...], preferred_element_type=f32)
    h1 = x + mamba_out                                       # residual 1

    # ---------------- ln2 + FFN ----------------
    xn2 = _layernorm(h1, ln2_w_ref[...], ln2_b_ref[...])
    f = jnp.dot(xn2, w1_ref[...], preferred_element_type=f32) + b1_ref[...]
    f = jnp.maximum(f, 0.0)
    f = jnp.dot(f, w2_ref[...], preferred_element_type=f32) + b2_ref[...]

    out_ref[0] = (h1 + f).astype(out_ref.dtype)              # residual 2


def block_forward(x, params):
    B, L, D = x.shape
    Di = params["w_in"].shape[1] // 2
    Ds = params["A_log"].shape[1]
    dt_rank = params["w_dt"].shape[0]
    d_conv = params["conv_w"].shape[0]
    f32 = jnp.float32

    # ---- Pre-split / pre-pad / pre-transform weights outside the kernel ----
    w_in_x = params["w_in"][:, :Di]
    w_in_z = params["w_in"][:, Di:]
    w_xp = params["w_xp"]
    # Pad dt low-rank dim to a multiple of 128 lanes (zero-padded columns/rows
    # cancel, so the result is unchanged but the matmul output is lane-dense).
    dt_rank_p = ((dt_rank + 127) // 128) * 128
    w_xp_dt = jnp.zeros((Di, dt_rank_p), f32).at[:, :dt_rank].set(
        w_xp[:, :dt_rank])
    w_xp_b = w_xp[:, dt_rank:dt_rank + Ds]
    w_xp_c = w_xp[:, dt_rank + Ds:dt_rank + 2 * Ds]
    w_dt = jnp.zeros((dt_rank_p, Di), f32).at[:dt_rank, :].set(params["w_dt"])
    A_T = -jnp.exp(params["A_log"]).T                        # (Ds, Di), precomputed

    plist = [
        params["ln1_w"], params["ln1_b"],
        w_in_x, w_in_z,
        params["conv_w"], params["conv_b"],
        w_xp_dt, w_xp_b, w_xp_c,
        w_dt, params["b_dt"],
        A_T, params["D_param"],
        params["w_out"],
        params["ln2_w"], params["ln2_b"],
        params["w1"], params["b1"], params["w2"], params["b2"],
    ]

    # Scan unroll factor: one f32 sublane tile when possible.
    T = 8 if L % 8 == 0 else (4 if L % 4 == 0 else (2 if L % 2 == 0 else 1))

    kernel = partial(block_kernel, L=L, d_inner=Di, d_state=Ds,
                     d_conv=d_conv, T=T)

    x_spec = pl.BlockSpec((1, L, D), lambda b: (b, 0, 0))

    def pspec(p):
        nd = p.ndim
        return pl.BlockSpec(p.shape, lambda b, _nd=nd: (0,) * _nd)

    return pl.pallas_call(
        kernel,
        out_shape=jax.ShapeDtypeStruct((B, L, D), x.dtype),
        grid_spec=pltpu.PrefetchScalarGridSpec(
            num_scalar_prefetch=0,
            grid=(B,),
            in_specs=[x_spec] + [pspec(p) for p in plist],
            out_specs=x_spec,
            scratch_shapes=[
                pltpu.VMEM((d_conv - 1 + L, Di), f32),   # xm + causal halo (conv)
                pltpu.VMEM((L, Di), f32),                # dt rows
                pltpu.VMEM((L, Di), f32),                # x_conv rows
                pltpu.VMEM((L, Di), f32),                # y rows from the scan
                pltpu.VMEM((L, Ds), f32),                # B rows
                pltpu.VMEM((L, Ds), f32),                # C rows
            ],
        ),
        compiler_params=pltpu.CompilerParams(
            dimension_semantics=("parallel",),           # batch elems independent
            # 48 MiB fits v7x's 64 MiB VMEM as well as v5e/v6e's 128 MiB.
            vmem_limit_bytes=48 * 1024 * 1024,
        ),
    )(x, *plist)


def make_params(key, D, d_state, d_conv, expand):
    Di = expand * D
    dt_rank = math.ceil(D / 16)
    ks = jax.random.split(key, 9)

    def w(k, shape, scale):
        return jax.random.normal(k, shape, jnp.float32) * scale

    return dict(
        ln1_w=jnp.ones((1, D), jnp.float32),
        ln1_b=jnp.zeros((1, D), jnp.float32),
        w_in=w(ks[0], (D, 2 * Di), D ** -0.5),
        conv_w=w(ks[1], (d_conv, Di), d_conv ** -0.5),
        conv_b=w(ks[2], (1, Di), 0.1),
        w_xp=w(ks[3], (Di, dt_rank + 2 * d_state), Di ** -0.5),
        w_dt=w(ks[4], (dt_rank, Di), dt_rank ** -0.5),
        b_dt=jnp.log(jnp.expm1(
            jax.random.uniform(ks[5], (1, Di), jnp.float32, 1e-3, 0.1))),
        A_log=jnp.log(jnp.broadcast_to(
            jnp.arange(1, d_state + 1, dtype=jnp.float32), (Di, d_state))),
        D_param=jnp.ones((1, Di), jnp.float32),
        w_out=w(ks[6], (Di, D), Di ** -0.5),
        ln2_w=jnp.ones((1, D), jnp.float32),
        ln2_b=jnp.zeros((1, D), jnp.float32),
        w1=w(ks[7], (D, 4 * D), D ** -0.5),
        b1=jnp.zeros((1, 4 * D), jnp.float32),
        w2=w(ks[8], (4 * D, D), (4 * D) ** -0.5),
        b2=jnp.zeros((1, D), jnp.float32),
    )


def block_reference(x, p):
    """Pure-JAX f32 reference (same numerics as the kernel)."""

    def mm(a, b):
        return jnp.dot(a, b, preferred_element_type=jnp.float32)

    B, L, D = x.shape
    Di = p["w_in"].shape[1] // 2
    Ds = p["A_log"].shape[1]
    dt_rank = p["w_dt"].shape[0]
    d_conv = p["conv_w"].shape[0]

    def ln(v, w, b):
        mu = jnp.mean(v, -1, keepdims=True)
        var = jnp.mean(jnp.square(v - mu), -1, keepdims=True)
        return (v - mu) / jnp.sqrt(var + 1e-5) * w + b

    xn = ln(x, p["ln1_w"], p["ln1_b"])
    xm = mm(xn, p["w_in"][:, :Di])
    z = mm(xn, p["w_in"][:, Di:])

    xpad = jnp.pad(xm, ((0, 0), (d_conv - 1, 0), (0, 0)))
    conv = p["conv_b"] + sum(
        p["conv_w"][k][None, None, :] * xpad[:, k:k + L, :] for k in range(d_conv))
    x_conv = jax.nn.silu(conv)

    dt_lr = mm(x_conv, p["w_xp"][:, :dt_rank])
    Bm = mm(x_conv, p["w_xp"][:, dt_rank:dt_rank + Ds])
    Cm = mm(x_conv, p["w_xp"][:, dt_rank + Ds:dt_rank + 2 * Ds])
    dt = jax.nn.softplus(mm(dt_lr, p["w_dt"]) + p["b_dt"])
    A = -jnp.exp(p["A_log"])                               # (Di, Ds)

    h = jnp.zeros((B, Di, Ds), jnp.float32)
    ys = []
    for t in range(L):
        dA = jnp.exp(dt[:, t, :, None] * A)
        h = dA * h + dt[:, t, :, None] * x_conv[:, t, :, None] * Bm[:, t, None, :]
        ys.append(jnp.sum(h * Cm[:, t, None, :], axis=-1))
    y = jnp.stack(ys, axis=1)

    y = y + x_conv * p["D_param"]
    y = y * jax.nn.silu(z)
    h1 = x + mm(y, p["w_out"])

    xn2 = ln(h1, p["ln2_w"], p["ln2_b"])
    f = mm(jnp.maximum(mm(xn2, p["w1"]) + p["b1"], 0.0), p["w2"]) + p["b2"]
    return h1 + f


if __name__ == "__main__":
    # Correctness harness only — do NOT benchmark at these toy shapes
    # (everything is below one (8,128) tile; bottlenecks don't transfer).
    B, L, D = 2, 8, 32            # batch, seq, n_embed
    d_state, d_conv, expand = 16, 4, 2

    key = jax.random.PRNGKey(0)
    kx, kp = jax.random.split(key)
    x = jax.random.normal(kx, (B, L, D), jnp.float32)
    params = make_params(kp, D, d_state, d_conv, expand)

    out = jax.jit(block_forward)(x, params)
    out = jax.block_until_ready(out)

    ref = block_reference(x, params)
    assert out.shape == (B, L, D) and out.dtype == jnp.float32
    max_err = float(jnp.max(jnp.abs(out - ref)))
    assert jnp.allclose(out, ref, atol=1e-3, rtol=1e-3), (
        f"mismatch vs reference (max abs err {max_err:.3e})")

    print("KERNEL_OK")
</pallas_src>

<mosaic_0001>
module attributes {stable_mosaic.version = 11 : i64} {
  func.func @block_kernel(%arg0: i32, %arg1: memref<1x8x32xf32, #tpu.memory_space<vmem>>, %arg2: memref<1x32xf32, #tpu.memory_space<vmem>>, %arg3: memref<1x32xf32, #tpu.memory_space<vmem>>, %arg4: memref<32x64xf32, #tpu.memory_space<vmem>>, %arg5: memref<32x64xf32, #tpu.memory_space<vmem>>, %arg6: memref<4x64xf32, #tpu.memory_space<vmem>>, %arg7: memref<1x64xf32, #tpu.memory_space<vmem>>, %arg8: memref<64x128xf32, #tpu.memory_space<vmem>>, %arg9: memref<64x16xf32, #tpu.memory_space<vmem>>, %arg10: memref<64x16xf32, #tpu.memory_space<vmem>>, %arg11: memref<128x64xf32, #tpu.memory_space<vmem>>, %arg12: memref<1x64xf32, #tpu.memory_space<vmem>>, %arg13: memref<16x64xf32, #tpu.memory_space<vmem>>, %arg14: memref<1x64xf32, #tpu.memory_space<vmem>>, %arg15: memref<64x32xf32, #tpu.memory_space<vmem>>, %arg16: memref<1x32xf32, #tpu.memory_space<vmem>>, %arg17: memref<1x32xf32, #tpu.memory_space<vmem>>, %arg18: memref<32x128xf32, #tpu.memory_space<vmem>>, %arg19: memref<1x128xf32, #tpu.memory_space<vmem>>, %arg20: memref<128x32xf32, #tpu.memory_space<vmem>>, %arg21: memref<1x32xf32, #tpu.memory_space<vmem>>, %arg22: memref<1x8x32xf32, #tpu.memory_space<vmem>>, %arg23: memref<11x64xf32, #tpu.memory_space<vmem>>, %arg24: memref<8x64xf32, #tpu.memory_space<vmem>>, %arg25: memref<8x64xf32, #tpu.memory_space<vmem>>, %arg26: memref<8x64xf32, #tpu.memory_space<vmem>>, %arg27: memref<8x16xf32, #tpu.memory_space<vmem>>, %arg28: memref<8x16xf32, #tpu.memory_space<vmem>>) attributes {dimension_semantics = [#tpu.dimension_semantics<parallel>], iteration_bounds = array<i64: 2>, scalar_prefetch = 0 : i64, scratch_operands = 6 : i64, tpu.core_type = #tpu.core_type<tc>, window_params = [{transform_indices = @transform_0, window_bounds = array<i64: 1, 8, 32>}, {pipeline_mode = #tpu.pipeline_mode<synchronous>, transform_indices = @transform_1, window_bounds = array<i64: 1, 32>}, {pipeline_mode = #tpu.pipeline_mode<synchronous>, transform_indices = @transform_2, window_bounds = array<i64: 1, 32>}, {pipeline_mode = #tpu.pipeline_mode<synchronous>, transform_indices = @transform_3, window_bounds = array<i64: 32, 64>}, {pipeline_mode = #tpu.pipeline_mode<synchronous>, transform_indices = @transform_4, window_bounds = array<i64: 32, 64>}, {pipeline_mode = #tpu.pipeline_mode<synchronous>, transform_indices = @transform_5, window_bounds = array<i64: 4, 64>}, {pipeline_mode = #tpu.pipeline_mode<synchronous>, transform_indices = @transform_6, window_bounds = array<i64: 1, 64>}, {pipeline_mode = #tpu.pipeline_mode<synchronous>, transform_indices = @transform_7, window_bounds = array<i64: 64, 128>}, {pipeline_mode = #tpu.pipeline_mode<synchronous>, transform_indices = @transform_8, window_bounds = array<i64: 64, 16>}, {pipeline_mode = #tpu.pipeline_mode<synchronous>, transform_indices = @transform_9, window_bounds = array<i64: 64, 16>}, {pipeline_mode = #tpu.pipeline_mode<synchronous>, transform_indices = @transform_10, window_bounds = array<i64: 128, 64>}, {pipeline_mode = #tpu.pipeline_mode<synchronous>, transform_indices = @transform_11, window_bounds = array<i64: 1, 64>}, {pipeline_mode = #tpu.pipeline_mode<synchronous>, transform_indices = @transform_12, window_bounds = array<i64: 16, 64>}, {pipeline_mode = #tpu.pipeline_mode<synchronous>, transform_indices = @transform_13, window_bounds = array<i64: 1, 64>}, {pipeline_mode = #tpu.pipeline_mode<synchronous>, transform_indices = @transform_14, window_bounds = array<i64: 64, 32>}, {pipeline_mode = #tpu.pipeline_mode<synchronous>, transform_indices = @transform_15, window_bounds = array<i64: 1, 32>}, {pipeline_mode = #tpu.pipeline_mode<synchronous>, transform_indices = @transform_16, window_bounds = array<i64: 1, 32>}, {pipeline_mode = #tpu.pipeline_mode<synchronous>, transform_indices = @transform_17, window_bounds = array<i64: 32, 128>}, {pipeline_mode = #tpu.pipeline_mode<synchronous>, transform_indices = @transform_18, window_bounds = array<i64: 1, 128>}, {pipeline_mode = #tpu.pipeline_mode<synchronous>, transform_indices = @transform_19, window_bounds = array<i64: 128, 32>}, {pipeline_mode = #tpu.pipeline_mode<synchronous>, transform_indices = @transform_20, window_bounds = array<i64: 1, 32>}, {transform_indices = @transform_21, window_bounds = array<i64: 1, 8, 32>}]} {
    %c0 = arith.constant 0 : index
    %c0_0 = arith.constant 0 : index
    %c0_1 = arith.constant 0 : index
    %0 = vector.load %arg1[%c0, %c0_0, %c0_1] : memref<1x8x32xf32, #tpu.memory_space<vmem>>, vector<1x8x32xf32>
    %1 = vector.shape_cast %0 : vector<1x8x32xf32> to vector<8x32xf32>
    %c0_2 = arith.constant 0 : index
    %c0_3 = arith.constant 0 : index
    %2 = vector.load %arg2[%c0_2, %c0_3] : memref<1x32xf32, #tpu.memory_space<vmem>>, vector<1x32xf32>
    %c0_4 = arith.constant 0 : index
    %c0_5 = arith.constant 0 : index
    %3 = vector.load %arg3[%c0_4, %c0_5] : memref<1x32xf32, #tpu.memory_space<vmem>>, vector<1x32xf32>
    %cst = arith.constant dense<0.000000e+00> : vector<8xf32>
    %4 = vector.multi_reduction <add>, %1, %cst [1] : vector<8x32xf32> to vector<8xf32>
    %5 = vector.shape_cast %4 : vector<8xf32> to vector<8x1xf32>
    %cst_6 = arith.constant 3.200000e+01 : f32
    %6 = vector.broadcast %cst_6 : f32 to vector<8x1xf32>
    %7 = arith.divf %5, %6 : vector<8x1xf32>
    %8 = vector.broadcast %7 : vector<8x1xf32> to vector<8x32xf32>
    %9 = arith.subf %1, %8 : vector<8x32xf32>
    %10 = arith.mulf %9, %9 : vector<8x32xf32>
    %cst_7 = arith.constant dense<0.000000e+00> : vector<8xf32>
    %11 = vector.multi_reduction <add>, %10, %cst_7 [1] : vector<8x32xf32> to vector<8xf32>
    %12 = vector.shape_cast %11 : vector<8xf32> to vector<8x1xf32>
    %cst_8 = arith.constant 3.200000e+01 : f32
    %13 = vector.broadcast %cst_8 : f32 to vector<8x1xf32>
    %14 = arith.divf %12, %13 : vector<8x1xf32>
    %15 = vector.broadcast %7 : vector<8x1xf32> to vector<8x32xf32>
    %16 = arith.subf %1, %15 : vector<8x32xf32>
    %cst_9 = arith.constant 9.99999974E-6 : f32
    %17 = vector.broadcast %cst_9 : f32 to vector<8x1xf32>
    %18 = arith.addf %14, %17 : vector<8x1xf32>
    %19 = math.rsqrt %18 : vector<8x1xf32>
    %20 = vector.broadcast %19 : vector<8x1xf32> to vector<8x32xf32>
    %21 = arith.mulf %16, %20 : vector<8x32xf32>
    %22 = vector.broadcast %2 : vector<1x32xf32> to vector<8x32xf32>
    %23 = arith.mulf %21, %22 : vector<8x32xf32>
    %24 = vector.broadcast %3 : vector<1x32xf32> to vector<8x32xf32>
    %25 = arith.addf %23, %24 : vector<8x32xf32>
    %c0_10 = arith.constant 0 : index
    %c0_11 = arith.constant 0 : index
    %26 = vector.load %arg4[%c0_10, %c0_11] : memref<32x64xf32, #tpu.memory_space<vmem>>, vector<32x64xf32>
    %cst_12 = arith.constant dense<0.000000e+00> : vector<8x64xf32>
    %27 = tpu.matmul %25, %26, %cst_12 {dimension_numbers = #tpu.dot_dimension_numbers<[1], [0], [0], [1], [0, 0, 1, 1], [], []>} : vector<8x32xf32>, vector<32x64xf32>, vector<8x64xf32> -> vector<8x64xf32>
    %c0_13 = arith.constant 0 : index
    %c0_14 = arith.constant 0 : index
    %28 = vector.load %arg5[%c0_13, %c0_14] : memref<32x64xf32, #tpu.memory_space<vmem>>, vector<32x64xf32>
    %cst_15 = arith.constant dense<0.000000e+00> : vector<8x64xf32>
    %29 = tpu.matmul %25, %28, %cst_15 {dimension_numbers = #tpu.dot_dimension_numbers<[1], [0], [0], [1], [0, 0, 1, 1], [], []>} : vector<8x32xf32>, vector<32x64xf32>, vector<8x64xf32> -> vector<8x64xf32>
    %cst_16 = arith.constant 0.000000e+00 : f32
    %30 = vector.broadcast %cst_16 : f32 to vector<3x64xf32>
    %c0_17 = arith.constant 0 : index
    %c0_18 = arith.constant 0 : index
    %31 = vector.load %arg23[%c0_17, %c0_18] : memref<11x64xf32, #tpu.memory_space<vmem>>, vector<3x64xf32>
    tpu.vector_store %arg23[%c0_17, %c0_18], %30 {strides = array<i32>} : memref<11x64xf32, #tpu.memory_space<vmem>>, vector<3x64xf32>,
    %c3 = arith.constant 3 : index
    %c0_19 = arith.constant 0 : index
    %32 = vector.load %arg23[%c3, %c0_19] : memref<11x64xf32, #tpu.memory_space<vmem>>, vector<8x64xf32>
    tpu.vector_store %arg23[%c3, %c0_19], %27 {strides = array<i32>} : memref<11x64xf32, #tpu.memory_space<vmem>>, vector<8x64xf32>,
    %cst_20 = arith.constant 0.000000e+00 : f32
    %33 = vector.broadcast %cst_20 : f32 to vector<8x64xf32>
    %c0_21 = arith.constant 0 : index
    %c0_22 = arith.constant 0 : index
    %34 = vector.load %arg7[%c0_21, %c0_22] : memref<1x64xf32, #tpu.memory_space<vmem>>, vector<1x64xf32>
    %35 = vector.broadcast %34 : vector<1x64xf32> to vector<8x64xf32>
    %36 = arith.addf %33, %35 : vector<8x64xf32>
    %c0_23 = arith.constant 0 : index
    %c0_24 = arith.constant 0 : index
    %37 = vector.load %arg6[%c0_23, %c0_24] : memref<4x64xf32, #tpu.memory_space<vmem>>, vector<1x64xf32>
    %c0_25 = arith.constant 0 : index
    %c0_26 = arith.constant 0 : index
    %38 = vector.load %arg23[%c0_25, %c0_26] : memref<11x64xf32, #tpu.memory_space<vmem>>, vector<8x64xf32>
    %39 = vector.broadcast %37 : vector<1x64xf32> to vector<8x64xf32>
    %40 = arith.mulf %39, %38 : vector<8x64xf32>
    %41 = arith.addf %36, %40 : vector<8x64xf32>
    %c1 = arith.constant 1 : index
    %c0_27 = arith.constant 0 : index
    %42 = vector.load %arg6[%c1, %c0_27] : memref<4x64xf32, #tpu.memory_space<vmem>>, vector<1x64xf32>
    %c1_28 = arith.constant 1 : index
    %c0_29 = arith.constant 0 : index
    %43 = vector.load %arg23[%c1_28, %c0_29] : memref<11x64xf32, #tpu.memory_space<vmem>>, vector<8x64xf32>
    %44 = vector.broadcast %42 : vector<1x64xf32> to vector<8x64xf32>
    %45 = arith.mulf %44, %43 : vector<8x64xf32>
    %46 = arith.addf %41, %45 : vector<8x64xf32>
    %c2 = arith.constant 2 : index
    %c0_30 = arith.constant 0 : index
    %47 = vector.load %arg6[%c2, %c0_30] : memref<4x64xf32, #tpu.memory_space<vmem>>, vector<1x64xf32>
    %c2_31 = arith.constant 2 : index
    %c0_32 = arith.constant 0 : index
    %48 = vector.load %arg23[%c2_31, %c0_32] : memref<11x64xf32, #tpu.memory_space<vmem>>, vector<8x64xf32>
    %49 = vector.broadcast %47 : vector<1x64xf32> to vector<8x64xf32>
    %50 = arith.mulf %49, %48 : vector<8x64xf32>
    %51 = arith.addf %46, %50 : vector<8x64xf32>
    %c3_33 = arith.constant 3 : index
    %c0_34 = arith.constant 0 : index
    %52 = vector.load %arg6[%c3_33, %c0_34] : memref<4x64xf32, #tpu.memory_space<vmem>>, vector<1x64xf32>
    %c3_35 = arith.constant 3 : index
    %c0_36 = arith.constant 0 : index
    %53 = vector.load %arg23[%c3_35, %c0_36] : memref<11x64xf32, #tpu.memory_space<vmem>>, vector<8x64xf32>
    %54 = vector.broadcast %52 : vector<1x64xf32> to vector<8x64xf32>
    %55 = arith.mulf %54, %53 : vector<8x64xf32>
    %56 = arith.addf %51, %55 : vector<8x64xf32>
    %57 = arith.negf %56 : vector<8x64xf32>
    %58 = math.exp %57 : vector<8x64xf32>
    %cst_37 = arith.constant 1.000000e+00 : f32
    %59 = vector.broadcast %cst_37 : f32 to vector<8x64xf32>
    %60 = arith.addf %59, %58 : vector<8x64xf32>
    %61 = arith.divf %59, %60 : vector<8x64xf32>
    %62 = arith.mulf %56, %61 : vector<8x64xf32>
    %c0_38 = arith.constant 0 : index
    %c0_39 = arith.constant 0 : index
    %63 = vector.load %arg8[%c0_38, %c0_39] : memref<64x128xf32, #tpu.memory_space<vmem>>, vector<64x128xf32>
    %cst_40 = arith.constant dense<0.000000e+00> : vector<8x128xf32>
    %64 = tpu.matmul %62, %63, %cst_40 {dimension_numbers = #tpu.dot_dimension_numbers<[1], [0], [0], [1], [0, 0, 1, 1], [], []>} : vector<8x64xf32>, vector<64x128xf32>, vector<8x128xf32> -> vector<8x128xf32>
    %c0_41 = arith.constant 0 : index
    %c0_42 = arith.constant 0 : index
    %65 = vector.load %arg9[%c0_41, %c0_42] : memref<64x16xf32, #tpu.memory_space<vmem>>, vector<64x16xf32>
    %cst_43 = arith.constant dense<0.000000e+00> : vector<8x16xf32>
    %66 = tpu.matmul %62, %65, %cst_43 {dimension_numbers = #tpu.dot_dimension_numbers<[1], [0], [0], [1], [0, 0, 1, 1], [], []>} : vector<8x64xf32>, vector<64x16xf32>, vector<8x16xf32> -> vector<8x16xf32>
    %c0_44 = arith.constant 0 : index
    %c0_45 = arith.constant 0 : index
    %67 = vector.load %arg10[%c0_44, %c0_45] : memref<64x16xf32, #tpu.memory_space<vmem>>, vector<64x16xf32>
    %cst_46 = arith.constant dense<0.000000e+00> : vector<8x16xf32>
    %68 = tpu.matmul %62, %67, %cst_46 {dimension_numbers = #tpu.dot_dimension_numbers<[1], [0], [0], [1], [0, 0, 1, 1], [], []>} : vector<8x64xf32>, vector<64x16xf32>, vector<8x16xf32> -> vector<8x16xf32>
    %c0_47 = arith.constant 0 : index
    %c0_48 = arith.constant 0 : index
    %69 = vector.load %arg11[%c0_47, %c0_48] : memref<128x64xf32, #tpu.memory_space<vmem>>, vector<128x64xf32>
    %cst_49 = arith.constant dense<0.000000e+00> : vector<8x64xf32>
    %70 = tpu.matmul %64, %69, %cst_49 {dimension_numbers = #tpu.dot_dimension_numbers<[1], [0], [0], [1], [0, 0, 1, 1], [], []>} : vector<8x128xf32>, vector<128x64xf32>, vector<8x64xf32> -> vector<8x64xf32>
    %c0_50 = arith.constant 0 : index
    %c0_51 = arith.constant 0 : index
    %71 = vector.load %arg12[%c0_50, %c0_51] : memref<1x64xf32, #tpu.memory_space<vmem>>, vector<1x64xf32>
    %72 = vector.broadcast %71 : vector<1x64xf32> to vector<8x64xf32>
    %73 = arith.addf %70, %72 : vector<8x64xf32>
    %cst_52 = arith.constant 0.000000e+00 : f32
    %74 = vector.broadcast %cst_52 : f32 to vector<8x64xf32>
    %75 = arith.maximumf %73, %74 : vector<8x64xf32>
    %76 = vector.broadcast %cst_52 : f32 to vector<8x64xf32>
    %77 = arith.subf %73, %76 : vector<8x64xf32>
    %78 = arith.cmpf one, %77, %77 : vector<8x64xf32>
    %79 = vector.broadcast %cst_52 : f32 to vector<8x64xf32>
    %80 = arith.addf %73, %79 : vector<8x64xf32>
    %81 = math.absf %77 : vector<8x64xf32>
    %cst_53 = arith.constant 0.000000e+00 : f32
    %82 = vector.broadcast %cst_53 : f32 to vector<8x64xf32>
    %83 = arith.subf %82, %81 : vector<8x64xf32>
    %84 = math.exp %83 : vector<8x64xf32>
    %85 = math.log1p %84 : vector<8x64xf32>
    %86 = arith.addf %75, %85 : vector<8x64xf32>
    %87 = arith.select %78, %80, %86 : vector<8x64xi1>, vector<8x64xf32>
    %c0_54 = arith.constant 0 : index
    %c0_55 = arith.constant 0 : index
    %88 = vector.load %arg24[%c0_54, %c0_55] : memref<8x64xf32, #tpu.memory_space<vmem>>, vector<8x64xf32>
    tpu.vector_store %arg24[%c0_54, %c0_55], %87 {strides = array<i32>} : memref<8x64xf32, #tpu.memory_space<vmem>>, vector<8x64xf32>,
    %c0_56 = arith.constant 0 : index
    %c0_57 = arith.constant 0 : index
    %89 = vector.load %arg25[%c0_56, %c0_57] : memref<8x64xf32, #tpu.memory_space<vmem>>, vector<8x64xf32>
    tpu.vector_store %arg25[%c0_56, %c0_57], %62 {strides = array<i32>} : memref<8x64xf32, #tpu.memory_space<vmem>>, vector<8x64xf32>,
    %c0_58 = arith.constant 0 : index
    %c0_59 = arith.constant 0 : index
    %90 = vector.load %arg27[%c0_58, %c0_59] : memref<8x16xf32, #tpu.memory_space<vmem>>, vector<8x16xf32>
    tpu.vector_store %arg27[%c0_58, %c0_59], %66 {strides = array<i32>} : memref<8x16xf32, #tpu.memory_space<vmem>>, vector<8x16xf32>,
    %c0_60 = arith.constant 0 : index
    %c0_61 = arith.constant 0 : index
    %91 = vector.load %arg28[%c0_60, %c0_61] : memref<8x16xf32, #tpu.memory_space<vmem>>, vector<8x16xf32>
    tpu.vector_store %arg28[%c0_60, %c0_61], %68 {strides = array<i32>} : memref<8x16xf32, #tpu.memory_space<vmem>>, vector<8x16xf32>,
    %c0_62 = arith.constant 0 : index
    %c0_63 = arith.constant 0 : index
    %92 = vector.load %arg13[%c0_62, %c0_63] : memref<16x64xf32, #tpu.memory_space<vmem>>, vector<16x64xf32>
    %93 = tpu.iota {dimensions = array<i32: 0>} : vector<16x16xi32>
    %94 = tpu.iota {dimensions = array<i32: 1>} : vector<16x16xi32>
    %95 = arith.cmpi eq, %93, %94 : vector<16x16xi32>
    %cst_64 = arith.constant 0.000000e+00 : f32
    %96 = vector.broadcast %cst_64 : f32 to vector<16x64xf32>
    %c0_i32 = arith.constant 0 : i32
    %c8_i32 = arith.constant 8 : i32
    %97 = arith.muli %c0_i32, %c8_i32 : i32
    %98 = tpu.assume_multiple %97, 8 : i32
    %99 = arith.index_cast %98 : i32 to index
    %c0_65 = arith.constant 0 : index
    %100 = vector.load %arg24[%99, %c0_65] : memref<8x64xf32, #tpu.memory_space<vmem>>, vector<8x64xf32>
    %101 = arith.index_cast %98 : i32 to index
    %c0_66 = arith.constant 0 : index
    %102 = vector.load %arg25[%101, %c0_66] : memref<8x64xf32, #tpu.memory_space<vmem>>, vector<8x64xf32>
    %103 = arith.index_cast %98 : i32 to index
    %c0_67 = arith.constant 0 : index
    %104 = vector.load %arg27[%103, %c0_67] : memref<8x16xf32, #tpu.memory_space<vmem>>, vector<8x16xf32>
    %105 = arith.index_cast %98 : i32 to index
    %c0_68 = arith.constant 0 : index
    %106 = vector.load %arg28[%105, %c0_68] : memref<8x16xf32, #tpu.memory_space<vmem>>, vector<8x16xf32>
    %107 = vector.extract_strided_slice %100 {offsets = [0, 0], sizes = [1, 64], strides = [1, 1]} : vector<8x64xf32> to vector<1x64xf32>
    %108 = vector.extract_strided_slice %102 {offsets = [0, 0], sizes = [1, 64], strides = [1, 1]} : vector<8x64xf32> to vector<1x64xf32>
    %109 = arith.mulf %107, %108 : vector<1x64xf32>
    %110 = vector.extract_strided_slice %104 {offsets = [0, 0], sizes = [1, 16], strides = [1, 1]} : vector<8x16xf32> to vector<1x16xf32>
    %cst_69 = arith.constant 0.000000e+00 : f32
    %111 = vector.shape_cast %110 : vector<1x16xf32> to vector<1x16xf32>
    %112 = vector.broadcast %111 : vector<1x16xf32> to vector<16x16xf32>
    %113 = vector.broadcast %cst_69 : f32 to vector<16x16xf32>
    %114 = arith.select %95, %112, %113 : vector<16x16xi1>, vector<16x16xf32>
    %cst_70 = arith.constant dense<0.000000e+00> : vector<16xf32>
    %115 = vector.multi_reduction <add>, %114, %cst_70 [1] : vector<16x16xf32> to vector<16xf32>
    %116 = vector.shape_cast %115 : vector<16xf32> to vector<16x1xf32>
    %117 = vector.extract_strided_slice %106 {offsets = [0, 0], sizes = [1, 16], strides = [1, 1]} : vector<8x16xf32> to vector<1x16xf32>
    %cst_71 = arith.constant 0.000000e+00 : f32
    %118 = vector.shape_cast %117 : vector<1x16xf32> to vector<1x16xf32>
    %119 = vector.broadcast %118 : vector<1x16xf32> to vector<16x16xf32>
    %120 = vector.broadcast %cst_71 : f32 to vector<16x16xf32>
    %121 = arith.select %95, %119, %120 : vector<16x16xi1>, vector<16x16xf32>
    %cst_72 = arith.constant dense<0.000000e+00> : vector<16xf32>
    %122 = vector.multi_reduction <add>, %121, %cst_72 [1] : vector<16x16xf32> to vector<16xf32>
    %123 = vector.shape_cast %122 : vector<16xf32> to vector<16x1xf32>
    %124 = vector.broadcast %107 : vector<1x64xf32> to vector<16x64xf32>
    %125 = arith.mulf %124, %92 : vector<16x64xf32>
    %126 = math.exp %125 : vector<16x64xf32>
    %127 = arith.mulf %126, %96 : vector<16x64xf32>
    %128 = vector.broadcast %116 : vector<16x1xf32> to vector<16x64xf32>
    %129 = vector.broadcast %109 : vector<1x64xf32> to vector<16x64xf32>
    %130 = arith.mulf %128, %129 : vector<16x64xf32>
    %131 = arith.addf %127, %130 : vector<16x64xf32>
    %132 = vector.broadcast %123 : vector<16x1xf32> to vector<16x64xf32>
    %133 = arith.mulf %131, %132 : vector<16x64xf32>
    %cst_73 = arith.constant dense<0.000000e+00> : vector<64xf32>
    %134 = vector.multi_reduction <add>, %133, %cst_73 [0] : vector<16x64xf32> to vector<64xf32>
    %135 = vector.shape_cast %134 : vector<64xf32> to vector<1x64xf32>
    %136 = vector.extract_strided_slice %100 {offsets = [1, 0], sizes = [1, 64], strides = [1, 1]} : vector<8x64xf32> to vector<1x64xf32>
    %137 = vector.extract_strided_slice %102 {offsets = [1, 0], sizes = [1, 64], strides = [1, 1]} : vector<8x64xf32> to vector<1x64xf32>
    %138 = arith.mulf %136, %137 : vector<1x64xf32>
    %139 = vector.extract_strided_slice %104 {offsets = [1, 0], sizes = [1, 16], strides = [1, 1]} : vector<8x16xf32> to vector<1x16xf32>
    %cst_74 = arith.constant 0.000000e+00 : f32
    %140 = vector.shape_cast %139 : vector<1x16xf32> to vector<1x16xf32>
    %141 = vector.broadcast %140 : vector<1x16xf32> to vector<16x16xf32>
    %142 = vector.broadcast %cst_74 : f32 to vector<16x16xf32>
    %143 = arith.select %95, %141, %142 : vector<16x16xi1>, vector<16x16xf32>
    %cst_75 = arith.constant dense<0.000000e+00> : vector<16xf32>
    %144 = vector.multi_reduction <add>, %143, %cst_75 [1] : vector<16x16xf32> to vector<16xf32>
    %145 = vector.shape_cast %144 : vector<16xf32> to vector<16x1xf32>
    %146 = vector.extract_strided_slice %106 {offsets = [1, 0], sizes = [1, 16], strides = [1, 1]} : vector<8x16xf32> to vector<1x16xf32>
    %cst_76 = arith.constant 0.000000e+00 : f32
    %147 = vector.shape_cast %146 : vector<1x16xf32> to vector<1x16xf32>
    %148 = vector.broadcast %147 : vector<1x16xf32> to vector<16x16xf32>
    %149 = vector.broadcast %cst_76 : f32 to vector<16x16xf32>
    %150 = arith.select %95, %148, %149 : vector<16x16xi1>, vector<16x16xf32>
    %cst_77 = arith.constant dense<0.000000e+00> : vector<16xf32>
    %151 = vector.multi_reduction <add>, %150, %cst_77 [1] : vector<16x16xf32> to vector<16xf32>
    %152 = vector.shape_cast %151 : vector<16xf32> to vector<16x1xf32>
    %153 = vector.broadcast %136 : vector<1x64xf32> to vector<16x64xf32>
    %154 = arith.mulf %153, %92 : vector<16x64xf32>
    %155 = math.exp %154 : vector<16x64xf32>
    %156 = arith.mulf %155, %131 : vector<16x64xf32>
    %157 = vector.broadcast %145 : vector<16x1xf32> to vector<16x64xf32>
    %158 = vector.broadcast %138 : vector<1x64xf32> to vector<16x64xf32>
    %159 = arith.mulf %157, %158 : vector<16x64xf32>
    %160 = arith.addf %156, %159 : vector<16x64xf32>
    %161 = vector.broadcast %152 : vector<16x1xf32> to vector<16x64xf32>
    %162 = arith.mulf %160, %161 : vector<16x64xf32>
    %cst_78 = arith.constant dense<0.000000e+00> : vector<64xf32>
    %163 = vector.multi_reduction <add>, %162, %cst_78 [0] : vector<16x64xf32> to vector<64xf32>
    %164 = vector.shape_cast %163 : vector<64xf32> to vector<1x64xf32>
    %165 = vector.extract_strided_slice %100 {offsets = [2, 0], sizes = [1, 64], strides = [1, 1]} : vector<8x64xf32> to vector<1x64xf32>
    %166 = vector.extract_strided_slice %102 {offsets = [2, 0], sizes = [1, 64], strides = [1, 1]} : vector<8x64xf32> to vector<1x64xf32>
    %167 = arith.mulf %165, %166 : vector<1x64xf32>
    %168 = vector.extract_strided_slice %104 {offsets = [2, 0], sizes = [1, 16], strides = [1, 1]} : vector<8x16xf32> to vector<1x16xf32>
    %cst_79 = arith.constant 0.000000e+00 : f32
    %169 = vector.shape_cast %168 : vector<1x16xf32> to vector<1x16xf32>
    %170 = vector.broadcast %169 : vector<1x16xf32> to vector<16x16xf32>
    %171 = vector.broadcast %cst_79 : f32 to vector<16x16xf32>
    %172 = arith.select %95, %170, %171 : vector<16x16xi1>, vector<16x16xf32>
    %cst_80 = arith.constant dense<0.000000e+00> : vector<16xf32>
    %173 = vector.multi_reduction <add>, %172, %cst_80 [1] : vector<16x16xf32> to vector<16xf32>
    %174 = vector.shape_cast %173 : vector<16xf32> to vector<16x1xf32>
    %175 = vector.extract_strided_slice %106 {offsets = [2, 0], sizes = [1, 16], strides = [1, 1]} : vector<8x16xf32> to vector<1x16xf32>
    %cst_81 = arith.constant 0.000000e+00 : f32
    %176 = vector.shape_cast %175 : vector<1x16xf32> to vector<1x16xf32>
    %177 = vector.broadcast %176 : vector<1x16xf32> to vector<16x16xf32>
    %178 = vector.broadcast %cst_81 : f32 to vector<16x16xf32>
    %179 = arith.select %95, %177, %178 : vector<16x16xi1>, vector<16x16xf32>
    %cst_82 = arith.constant dense<0.000000e+00> : vector<16xf32>
    %180 = vector.multi_reduction <add>, %179, %cst_82 [1] : vector<16x16xf32> to vector<16xf32>
    %181 = vector.shape_cast %180 : vector<16xf32> to vector<16x1xf32>
    %182 = vector.broadcast %165 : vector<1x64xf32> to vector<16x64xf32>
    %183 = arith.mulf %182, %92 : vector<16x64xf32>
    %184 = math.exp %183 : vector<16x64xf32>
    %185 = arith.mulf %184, %160 : vector<16x64xf32>
    %186 = vector.broadcast %174 : vector<16x1xf32> to vector<16x64xf32>
    %187 = vector.broadcast %167 : vector<1x64xf32> to vector<16x64xf32>
    %188 = arith.mulf %186, %187 : vector<16x64xf32>
    %189 = arith.addf %185, %188 : vector<16x64xf32>
    %190 = vector.broadcast %181 : vector<16x1xf32> to vector<16x64xf32>
    %191 = arith.mulf %189, %190 : vector<16x64xf32>
    %cst_83 = arith.constant dense<0.000000e+00> : vector<64xf32>
    %192 = vector.multi_reduction <add>, %191, %cst_83 [0] : vector<16x64xf32> to vector<64xf32>
    %193 = vector.shape_cast %192 : vector<64xf32> to vector<1x64xf32>
    %194 = vector.extract_strided_slice %100 {offsets = [3, 0], sizes = [1, 64], strides = [1, 1]} : vector<8x64xf32> to vector<1x64xf32>
    %195 = vector.extract_strided_slice %102 {offsets = [3, 0], sizes = [1, 64], strides = [1, 1]} : vector<8x64xf32> to vector<1x64xf32>
    %196 = arith.mulf %194, %195 : vector<1x64xf32>
    %197 = vector.extract_strided_slice %104 {offsets = [3, 0], sizes = [1, 16], strides = [1, 1]} : vector<8x16xf32> to vector<1x16xf32>
    %cst_84 = arith.constant 0.000000e+00 : f32
    %198 = vector.shape_cast %197 : vector<1x16xf32> to vector<1x16xf32>
    %199 = vector.broadcast %198 : vector<1x16xf32> to vector<16x16xf32>
    %200 = vector.broadcast %cst_84 : f32 to vector<16x16xf32>
    %201 = arith.select %95, %199, %200 : vector<16x16xi1>, vector<16x16xf32>
    %cst_85 = arith.constant dense<0.000000e+00> : vector<16xf32>
    %202 = vector.multi_reduction <add>, %201, %cst_85 [1] : vector<16x16xf32> to vector<16xf32>
    %203 = vector.shape_cast %202 : vector<16xf32> to vector<16x1xf32>
    %204 = vector.extract_strided_slice %106 {offsets = [3, 0], sizes = [1, 16], strides = [1, 1]} : vector<8x16xf32> to vector<1x16xf32>
    %cst_86 = arith.constant 0.000000e+00 : f32
    %205 = vector.shape_cast %204 : vector<1x16xf32> to vector<1x16xf32>
    %206 = vector.broadcast %205 : vector<1x16xf32> to vector<16x16xf32>
    %207 = vector.broadcast %cst_86 : f32 to vector<16x16xf32>
    %208 = arith.select %95, %206, %207 : vector<16x16xi1>, vector<16x16xf32>
    %cst_87 = arith.constant dense<0.000000e+00> : vector<16xf32>
    %209 = vector.multi_reduction <add>, %208, %cst_87 [1] : vector<16x16xf32> to vector<16xf32>
    %210 = vector.shape_cast %209 : vector<16xf32> to vector<16x1xf32>
    %211 = vector.broadcast %194 : vector<1x64xf32> to vector<16x64xf32>
    %212 = arith.mulf %211, %92 : vector<16x64xf32>
    %213 = math.exp %212 : vector<16x64xf32>
    %214 = arith.mulf %213, %189 : vector<16x64xf32>
    %215 = vector.broadcast %203 : vector<16x1xf32> to vector<16x64xf32>
    %216 = vector.broadcast %196 : vector<1x64xf32> to vector<16x64xf32>
    %217 = arith.mulf %215, %216 : vector<16x64xf32>
    %218 = arith.addf %214, %217 : vector<16x64xf32>
    %219 = vector.broadcast %210 : vector<16x1xf32> to vector<16x64xf32>
    %220 = arith.mulf %218, %219 : vector<16x64xf32>
    %cst_88 = arith.constant dense<0.000000e+00> : vector<64xf32>
    %221 = vector.multi_reduction <add>, %220, %cst_88 [0] : vector<16x64xf32> to vector<64xf32>
    %222 = vector.shape_cast %221 : vector<64xf32> to vector<1x64xf32>
    %223 = vector.extract_strided_slice %100 {offsets = [4, 0], sizes = [1, 64], strides = [1, 1]} : vector<8x64xf32> to vector<1x64xf32>
    %224 = vector.extract_strided_slice %102 {offsets = [4, 0], sizes = [1, 64], strides = [1, 1]} : vector<8x64xf32> to vector<1x64xf32>
    %225 = arith.mulf %223, %224 : vector<1x64xf32>
    %226 = vector.extract_strided_slice %104 {offsets = [4, 0], sizes = [1, 16], strides = [1, 1]} : vector<8x16xf32> to vector<1x16xf32>
    %cst_89 = arith.constant 0.000000e+00 : f32
    %227 = vector.shape_cast %226 : vector<1x16xf32> to vector<1x16xf32>
    %228 = vector.broadcast %227 : vector<1x16xf32> to vector<16x16xf32>
    %229 = vector.broadcast %cst_89 : f32 to vector<16x16xf32>
    %230 = arith.select %95, %228, %229 : vector<16x16xi1>, vector<16x16xf32>
    %cst_90 = arith.constant dense<0.000000e+00> : vector<16xf32>
    %231 = vector.multi_reduction <add>, %230, %cst_90 [1] : vector<16x16xf32> to vector<16xf32>
    %232 = vector.shape_cast %231 : vector<16xf32> to vector<16x1xf32>
    %233 = vector.extract_strided_slice %106 {offsets = [4, 0], sizes = [1, 16], strides = [1, 1]} : vector<8x16xf32> to vector<1x16xf32>
    %cst_91 = arith.constant 0.000000e+00 : f32
    %234 = vector.shape_cast %233 : vector<1x16xf32> to vector<1x16xf32>
    %235 = vector.broadcast %234 : vector<1x16xf32> to vector<16x16xf32>
    %236 = vector.broadcast %cst_91 : f32 to vector<16x16xf32>
    %237 = arith.select %95, %235, %236 : vector<16x16xi1>, vector<16x16xf32>
    %cst_92 = arith.constant dense<0.000000e+00> : vector<16xf32>
    %238 = vector.multi_reduction <add>, %237, %cst_92 [1] : vector<16x16xf32> to vector<16xf32>
    %239 = vector.shape_cast %238 : vector<16xf32> to vector<16x1xf32>
    %240 = vector.broadcast %223 : vector<1x64xf32> to vector<16x64xf32>
    %241 = arith.mulf %240, %92 : vector<16x64xf32>
    %242 = math.exp %241 : vector<16x64xf32>
    %243 = arith.mulf %242, %218 : vector<16x64xf32>
    %244 = vector.broadcast %232 : vector<16x1xf32> to vector<16x64xf32>
    %245 = vector.broadcast %225 : vector<1x64xf32> to vector<16x64xf32>
    %246 = arith.mulf %244, %245 : vector<16x64xf32>
    %247 = arith.addf %243, %246 : vector<16x64xf32>
    %248 = vector.broadcast %239 : vector<16x1xf32> to vector<16x64xf32>
    %249 = arith.mulf %247, %248 : vector<16x64xf32>
    %cst_93 = arith.constant dense<0.000000e+00> : vector<64xf32>
    %250 = vector.multi_reduction <add>, %249, %cst_93 [0] : vector<16x64xf32> to vector<64xf32>
    %251 = vector.shape_cast %250 : vector<64xf32> to vector<1x64xf32>
    %252 = vector.extract_strided_slice %100 {offsets = [5, 0], sizes = [1, 64], strides = [1, 1]} : vector<8x64xf32> to vector<1x64xf32>
    %253 = vector.extract_strided_slice %102 {offsets = [5, 0], sizes = [1, 64], strides = [1, 1]} : vector<8x64xf32> to vector<1x64xf32>
    %254 = arith.mulf %252, %253 : vector<1x64xf32>
    %255 = vector.extract_strided_slice %104 {offsets = [5, 0], sizes = [1, 16], strides = [1, 1]} : vector<8x16xf32> to vector<1x16xf32>
    %cst_94 = arith.constant 0.000000e+00 : f32
    %256 = vector.shape_cast %255 : vector<1x16xf32> to vector<1x16xf32>
    %257 = vector.broadcast %256 : vector<1x16xf32> to vector<16x16xf32>
    %258 = vector.broadcast %cst_94 : f32 to vector<16x16xf32>
    %259 = arith.select %95, %257, %258 : vector<16x16xi1>, vector<16x16xf32>
    %cst_95 = arith.constant dense<0.000000e+00> : vector<16xf32>
    %260 = vector.multi_reduction <add>, %259, %cst_95 [1] : vector<16x16xf32> to vector<16xf32>
    %261 = vector.shape_cast %260 : vector<16xf32> to vector<16x1xf32>
    %262 = vector.extract_strided_slice %106 {offsets = [5, 0], sizes = [1, 16], strides = [1, 1]} : vector<8x16xf32> to vector<1x16xf32>
    %cst_96 = arith.constant 0.000000e+00 : f32
    %263 = vector.shape_cast %262 : vector<1x16xf32> to vector<1x16xf32>
    %264 = vector.broadcast %263 : vector<1x16xf32> to vector<16x16xf32>
    %265 = vector.broadcast %cst_96 : f32 to vector<16x16xf32>
    %266 = arith.select %95, %264, %265 : vector<16x16xi1>, vector<16x16xf32>
    %cst_97 = arith.constant dense<0.000000e+00> : vector<16xf32>
    %267 = vector.multi_reduction <add>, %266, %cst_97 [1] : vector<16x16xf32> to vector<16xf32>
    %268 = vector.shape_cast %267 : vector<16xf32> to vector<16x1xf32>
    %269 = vector.broadcast %252 : vector<1x64xf32> to vector<16x64xf32>
    %270 = arith.mulf %269, %92 : vector<16x64xf32>
    %271 = math.exp %270 : vector<16x64xf32>
    %272 = arith.mulf %271, %247 : vector<16x64xf32>
    %273 = vector.broadcast %261 : vector<16x1xf32> to vector<16x64xf32>
    %274 = vector.broadcast %254 : vector<1x64xf32> to vector<16x64xf32>
    %275 = arith.mulf %273, %274 : vector<16x64xf32>
    %276 = arith.addf %272, %275 : vector<16x64xf32>
    %277 = vector.broadcast %268 : vector<16x1xf32> to vector<16x64xf32>
    %278 = arith.mulf %276, %277 : vector<16x64xf32>
    %cst_98 = arith.constant dense<0.000000e+00> : vector<64xf32>
    %279 = vector.multi_reduction <add>, %278, %cst_98 [0] : vector<16x64xf32> to vector<64xf32>
    %280 = vector.shape_cast %279 : vector<64xf32> to vector<1x64xf32>
    %281 = vector.extract_strided_slice %100 {offsets = [6, 0], sizes = [1, 64], strides = [1, 1]} : vector<8x64xf32> to vector<1x64xf32>
    %282 = vector.extract_strided_slice %102 {offsets = [6, 0], sizes = [1, 64], strides = [1, 1]} : vector<8x64xf32> to vector<1x64xf32>
    %283 = arith.mulf %281, %282 : vector<1x64xf32>
    %284 = vector.extract_strided_slice %104 {offsets = [6, 0], sizes = [1, 16], strides = [1, 1]} : vector<8x16xf32> to vector<1x16xf32>
    %cst_99 = arith.constant 0.000000e+00 : f32
    %285 = vector.shape_cast %284 : vector<1x16xf32> to vector<1x16xf32>
    %286 = vector.broadcast %285 : vector<1x16xf32> to vector<16x16xf32>
    %287 = vector.broadcast %cst_99 : f32 to vector<16x16xf32>
    %288 = arith.select %95, %286, %287 : vector<16x16xi1>, vector<16x16xf32>
    %cst_100 = arith.constant dense<0.000000e+00> : vector<16xf32>
    %289 = vector.multi_reduction <add>, %288, %cst_100 [1] : vector<16x16xf32> to vector<16xf32>
    %290 = vector.shape_cast %289 : vector<16xf32> to vector<16x1xf32>
    %291 = vector.extract_strided_slice %106 {offsets = [6, 0], sizes = [1, 16], strides = [1, 1]} : vector<8x16xf32> to vector<1x16xf32>
    %cst_101 = arith.constant 0.000000e+00 : f32
    %292 = vector.shape_cast %291 : vector<1x16xf32> to vector<1x16xf32>
    %293 = vector.broadcast %292 : vector<1x16xf32> to vector<16x16xf32>
    %294 = vector.broadcast %cst_101 : f32 to vector<16x16xf32>
    %295 = arith.select %95, %293, %294 : vector<16x16xi1>, vector<16x16xf32>
    %cst_102 = arith.constant dense<0.000000e+00> : vector<16xf32>
    %296 = vector.multi_reduction <add>, %295, %cst_102 [1] : vector<16x16xf32> to vector<16xf32>
    %297 = vector.shape_cast %296 : vector<16xf32> to vector<16x1xf32>
    %298 = vector.broadcast %281 : vector<1x64xf32> to vector<16x64xf32>
    %299 = arith.mulf %298, %92 : vector<16x64xf32>
    %300 = math.exp %299 : vector<16x64xf32>
    %301 = arith.mulf %300, %276 : vector<16x64xf32>
    %302 = vector.broadcast %290 : vector<16x1xf32> to vector<16x64xf32>
    %303 = vector.broadcast %283 : vector<1x64xf32> to vector<16x64xf32>
    %304 = arith.mulf %302, %303 : vector<16x64xf32>
    %305 = arith.addf %301, %304 : vector<16x64xf32>
    %306 = vector.broadcast %297 : vector<16x1xf32> to vector<16x64xf32>
    %307 = arith.mulf %305, %306 : vector<16x64xf32>
    %cst_103 = arith.constant dense<0.000000e+00> : vector<64xf32>
    %308 = vector.multi_reduction <add>, %307, %cst_103 [0] : vector<16x64xf32> to vector<64xf32>
    %309 = vector.shape_cast %308 : vector<64xf32> to vector<1x64xf32>
    %310 = vector.extract_strided_slice %100 {offsets = [7, 0], sizes = [1, 64], strides = [1, 1]} : vector<8x64xf32> to vector<1x64xf32>
    %311 = vector.extract_strided_slice %102 {offsets = [7, 0], sizes = [1, 64], strides = [1, 1]} : vector<8x64xf32> to vector<1x64xf32>
    %312 = arith.mulf %310, %311 : vector<1x64xf32>
    %313 = vector.extract_strided_slice %104 {offsets = [7, 0], sizes = [1, 16], strides = [1, 1]} : vector<8x16xf32> to vector<1x16xf32>
    %cst_104 = arith.constant 0.000000e+00 : f32
    %314 = vector.shape_cast %313 : vector<1x16xf32> to vector<1x16xf32>
    %315 = vector.broadcast %314 : vector<1x16xf32> to vector<16x16xf32>
    %316 = vector.broadcast %cst_104 : f32 to vector<16x16xf32>
    %317 = arith.select %95, %315, %316 : vector<16x16xi1>, vector<16x16xf32>
    %cst_105 = arith.constant dense<0.000000e+00> : vector<16xf32>
    %318 = vector.multi_reduction <add>, %317, %cst_105 [1] : vector<16x16xf32> to vector<16xf32>
    %319 = vector.shape_cast %318 : vector<16xf32> to vector<16x1xf32>
    %320 = vector.extract_strided_slice %106 {offsets = [7, 0], sizes = [1, 16], strides = [1, 1]} : vector<8x16xf32> to vector<1x16xf32>
    %cst_106 = arith.constant 0.000000e+00 : f32
    %321 = vector.shape_cast %320 : vector<1x16xf32> to vector<1x16xf32>
    %322 = vector.broadcast %321 : vector<1x16xf32> to vector<16x16xf32>
    %323 = vector.broadcast %cst_106 : f32 to vector<16x16xf32>
    %324 = arith.select %95, %322, %323 : vector<16x16xi1>, vector<16x16xf32>
    %cst_107 = arith.constant dense<0.000000e+00> : vector<16xf32>
    %325 = vector.multi_reduction <add>, %324, %cst_107 [1] : vector<16x16xf32> to vector<16xf32>
    %326 = vector.shape_cast %325 : vector<16xf32> to vector<16x1xf32>
    %327 = vector.broadcast %310 : vector<1x64xf32> to vector<16x64xf32>
    %328 = arith.mulf %327, %92 : vector<16x64xf32>
    %329 = math.exp %328 : vector<16x64xf32>
    %330 = arith.mulf %329, %305 : vector<16x64xf32>
    %331 = vector.broadcast %319 : vector<16x1xf32> to vector<16x64xf32>
    %332 = vector.broadcast %312 : vector<1x64xf32> to vector<16x64xf32>
    %333 = arith.mulf %331, %332 : vector<16x64xf32>
    %334 = arith.addf %330, %333 : vector<16x64xf32>
    %335 = vector.broadcast %326 : vector<16x1xf32> to vector<16x64xf32>
    %336 = arith.mulf %334, %335 : vector<16x64xf32>
    %cst_108 = arith.constant dense<0.000000e+00> : vector<64xf32>
    %337 = vector.multi_reduction <add>, %336, %cst_108 [0] : vector<16x64xf32> to vector<64xf32>
    %338 = vector.shape_cast %337 : vector<64xf32> to vector<1x64xf32>
    %339 = tpu.concatenate %135, %164, %193, %222, %251, %280, %309, %338 in 0 : vector<1x64xf32>, vector<1x64xf32>, vector<1x64xf32>, vector<1x64xf32>, vector<1x64xf32>, vector<1x64xf32>, vector<1x64xf32>, vector<1x64xf32> -> vector<8x64xf32>
    %340 = arith.index_cast %98 : i32 to index
    %c0_109 = arith.constant 0 : index
    %341 = vector.load %arg26[%340, %c0_109] : memref<8x64xf32, #tpu.memory_space<vmem>>, vector<8x64xf32>
    tpu.vector_store %arg26[%340, %c0_109], %339 {strides = array<i32>} : memref<8x64xf32, #tpu.memory_space<vmem>>, vector<8x64xf32>,
    %c1_i32 = arith.constant 1 : i32
    %c0_110 = arith.constant 0 : index
    %c0_111 = arith.constant 0 : index
    %342 = vector.load %arg26[%c0_110, %c0_111] : memref<8x64xf32, #tpu.memory_space<vmem>>, vector<8x64xf32>
    %c0_112 = arith.constant 0 : index
    %c0_113 = arith.constant 0 : index
    %343 = vector.load %arg14[%c0_112, %c0_113] : memref<1x64xf32, #tpu.memory_space<vmem>>, vector<1x64xf32>
    %344 = vector.broadcast %343 : vector<1x64xf32> to vector<8x64xf32>
    %345 = arith.mulf %62, %344 : vector<8x64xf32>
    %346 = arith.addf %342, %345 : vector<8x64xf32>
    %347 = arith.negf %29 : vector<8x64xf32>
    %348 = math.exp %347 : vector<8x64xf32>
    %cst_114 = arith.constant 1.000000e+00 : f32
    %349 = vector.broadcast %cst_114 : f32 to vector<8x64xf32>
    %350 = arith.addf %349, %348 : vector<8x64xf32>
    %351 = arith.divf %349, %350 : vector<8x64xf32>
    %352 = arith.mulf %29, %351 : vector<8x64xf32>
    %353 = arith.mulf %346, %352 : vector<8x64xf32>
    %c0_115 = arith.constant 0 : index
    %c0_116 = arith.constant 0 : index
    %354 = vector.load %arg15[%c0_115, %c0_116] : memref<64x32xf32, #tpu.memory_space<vmem>>, vector<64x32xf32>
    %cst_117 = arith.constant dense<0.000000e+00> : vector<8x32xf32>
    %355 = tpu.matmul %353, %354, %cst_117 {dimension_numbers = #tpu.dot_dimension_numbers<[1], [0], [0], [1], [0, 0, 1, 1], [], []>} : vector<8x64xf32>, vector<64x32xf32>, vector<8x32xf32> -> vector<8x32xf32>
    %356 = arith.addf %1, %355 : vector<8x32xf32>
    %c0_118 = arith.constant 0 : index
    %c0_119 = arith.constant 0 : index
    %357 = vector.load %arg16[%c0_118, %c0_119] : memref<1x32xf32, #tpu.memory_space<vmem>>, vector<1x32xf32>
    %c0_120 = arith.constant 0 : index
    %c0_121 = arith.constant 0 : index
    %358 = vector.load %arg17[%c0_120, %c0_121] : memref<1x32xf32, #tpu.memory_space<vmem>>, vector<1x32xf32>
    %cst_122 = arith.constant dense<0.000000e+00> : vector<8xf32>
    %359 = vector.multi_reduction <add>, %356, %cst_122 [1] : vector<8x32xf32> to vector<8xf32>
    %360 = vector.shape_cast %359 : vector<8xf32> to vector<8x1xf32>
    %cst_123 = arith.constant 3.200000e+01 : f32
    %361 = vector.broadcast %cst_123 : f32 to vector<8x1xf32>
    %362 = arith.divf %360, %361 : vector<8x1xf32>
    %363 = vector.broadcast %362 : vector<8x1xf32> to vector<8x32xf32>
    %364 = arith.subf %356, %363 : vector<8x32xf32>
    %365 = arith.mulf %364, %364 : vector<8x32xf32>
    %cst_124 = arith.constant dense<0.000000e+00> : vector<8xf32>
    %366 = vector.multi_reduction <add>, %365, %cst_124 [1] : vector<8x32xf32> to vector<8xf32>
    %367 = vector.shape_cast %366 : vector<8xf32> to vector<8x1xf32>
    %cst_125 = arith.constant 3.200000e+01 : f32
    %368 = vector.broadcast %cst_125 : f32 to vector<8x1xf32>
    %369 = arith.divf %367, %368 : vector<8x1xf32>
    %370 = vector.broadcast %362 : vector<8x1xf32> to vector<8x32xf32>
    %371 = arith.subf %356, %370 : vector<8x32xf32>
    %cst_126 = arith.constant 9.99999974E-6 : f32
    %372 = vector.broadcast %cst_126 : f32 to vector<8x1xf32>
    %373 = arith.addf %369, %372 : vector<8x1xf32>
    %374 = math.rsqrt %373 : vector<8x1xf32>
    %375 = vector.broadcast %374 : vector<8x1xf32> to vector<8x32xf32>
    %376 = arith.mulf %371, %375 : vector<8x32xf32>
    %377 = vector.broadcast %357 : vector<1x32xf32> to vector<8x32xf32>
    %378 = arith.mulf %376, %377 : vector<8x32xf32>
    %379 = vector.broadcast %358 : vector<1x32xf32> to vector<8x32xf32>
    %380 = arith.addf %378, %379 : vector<8x32xf32>
    %c0_127 = arith.constant 0 : index
    %c0_128 = arith.constant 0 : index
    %381 = vector.load %arg18[%c0_127, %c0_128] : memref<32x128xf32, #tpu.memory_space<vmem>>, vector<32x128xf32>
    %cst_129 = arith.constant dense<0.000000e+00> : vector<8x128xf32>
    %382 = tpu.matmul %380, %381, %cst_129 {dimension_numbers = #tpu.dot_dimension_numbers<[1], [0], [0], [1], [0, 0, 1, 1], [], []>} : vector<8x32xf32>, vector<32x128xf32>, vector<8x128xf32> -> vector<8x128xf32>
    %c0_130 = arith.constant 0 : index
    %c0_131 = arith.constant 0 : index
    %383 = vector.load %arg19[%c0_130, %c0_131] : memref<1x128xf32, #tpu.memory_space<vmem>>, vector<1x128xf32>
    %384 = vector.broadcast %383 : vector<1x128xf32> to vector<8x128xf32>
    %385 = arith.addf %382, %384 : vector<8x128xf32>
    %cst_132 = arith.constant 0.000000e+00 : f32
    %386 = vector.broadcast %cst_132 : f32 to vector<8x128xf32>
    %387 = arith.maximumf %385, %386 : vector<8x128xf32>
    %c0_133 = arith.constant 0 : index
    %c0_134 = arith.constant 0 : index
    %388 = vector.load %arg20[%c0_133, %c0_134] : memref<128x32xf32, #tpu.memory_space<vmem>>, vector<128x32xf32>
    %cst_135 = arith.constant dense<0.000000e+00> : vector<8x32xf32>
    %389 = tpu.matmul %387, %388, %cst_135 {dimension_numbers = #tpu.dot_dimension_numbers<[1], [0], [0], [1], [0, 0, 1, 1], [], []>} : vector<8x128xf32>, vector<128x32xf32>, vector<8x32xf32> -> vector<8x32xf32>
    %c0_136 = arith.constant 0 : index
    %c0_137 = arith.constant 0 : index
    %390 = vector.load %arg21[%c0_136, %c0_137] : memref<1x32xf32, #tpu.memory_space<vmem>>, vector<1x32xf32>
    %391 = vector.broadcast %390 : vector<1x32xf32> to vector<8x32xf32>
    %392 = arith.addf %389, %391 : vector<8x32xf32>
    %393 = arith.addf %356, %392 : vector<8x32xf32>
    %c0_138 = arith.constant 0 : index
    %c0_139 = arith.constant 0 : index
    %c0_140 = arith.constant 0 : index
    %394 = vector.load %arg22[%c0_138, %c0_139, %c0_140] : memref<1x8x32xf32, #tpu.memory_space<vmem>>, vector<1x8x32xf32>
    %395 = vector.shape_cast %394 : vector<1x8x32xf32> to vector<8x32xf32>
    %396 = vector.shape_cast %393 : vector<8x32xf32> to vector<1x8x32xf32>
    tpu.vector_store %arg22[%c0_138, %c0_139, %c0_140], %396 {strides = array<i32>} : memref<1x8x32xf32, #tpu.memory_space<vmem>>, vector<1x8x32xf32>,
    return
  }
  func.func @transform_0(%arg0: i32) -> (i32, i32, i32) {
    %c0_i32 = arith.constant 0 : i32
    %c0_i32_0 = arith.constant 0 : i32
    %c0_i32_1 = arith.constant 0 : i32
    return %arg0, %c0_i32, %c0_i32_0 : i32, i32, i32
  }
  func.func @transform_1(%arg0: i32) -> (i32, i32) {
    %c0_i32 = arith.constant 0 : i32
    %c0_i32_0 = arith.constant 0 : i32
    %c0_i32_1 = arith.constant 0 : i32
    return %c0_i32, %c0_i32_0 : i32, i32
  }
  func.func @transform_2(%arg0: i32) -> (i32, i32) {
    %c0_i32 = arith.constant 0 : i32
    %c0_i32_0 = arith.constant 0 : i32
    %c0_i32_1 = arith.constant 0 : i32
    return %c0_i32, %c0_i32_0 : i32, i32
  }
  func.func @transform_3(%arg0: i32) -> (i32, i32) {
    %c0_i32 = arith.constant 0 : i32
    %c0_i32_0 = arith.constant 0 : i32
    %c0_i32_1 = arith.constant 0 : i32
    return %c0_i32, %c0_i32_0 : i32, i32
  }
  func.func @transform_4(%arg0: i32) -> (i32, i32) {
    %c0_i32 = arith.constant 0 : i32
    %c0_i32_0 = arith.constant 0 : i32
    %c0_i32_1 = arith.constant 0 : i32
    return %c0_i32, %c0_i32_0 : i32, i32
  }
  func.func @transform_5(%arg0: i32) -> (i32, i32) {
    %c0_i32 = arith.constant 0 : i32
    %c0_i32_0 = arith.constant 0 : i32
    %c0_i32_1 = arith.constant 0 : i32
    return %c0_i32, %c0_i32_0 : i32, i32
  }
  func.func @transform_6(%arg0: i32) -> (i32, i32) {
    %c0_i32 = arith.constant 0 : i32
    %c0_i32_0 = arith.constant 0 : i32
    %c0_i32_1 = arith.constant 0 : i32
    return %c0_i32, %c0_i32_0 : i32, i32
  }
  func.func @transform_7(%arg0: i32) -> (i32, i32) {
    %c0_i32 = arith.constant 0 : i32
    %c0_i32_0 = arith.constant 0 : i32
    %c0_i32_1 = arith.constant 0 : i32
    return %c0_i32, %c0_i32_0 : i32, i32
  }
  func.func @transform_8(%arg0: i32) -> (i32, i32) {
    %c0_i32 = arith.constant 0 : i32
    %c0_i32_0 = arith.constant 0 : i32
    %c0_i32_1 = arith.constant 0 : i32
    return %c0_i32, %c0_i32_0 : i32, i32
  }
  func.func @transform_9(%arg0: i32) -> (i32, i32) {
    %c0_i32 = arith.constant 0 : i32
    %c0_i32_0 = arith.constant 0 : i32
    %c0_i32_1 = arith.constant 0 : i32
    return %c0_i32, %c0_i32_0 : i32, i32
  }
  func.func @transform_10(%arg0: i32) -> (i32, i32) {
    %c0_i32 = arith.constant 0 : i32
    %c0_i32_0 = arith.constant 0 : i32
    %c0_i32_1 = arith.constant 0 : i32
    return %c0_i32, %c0_i32_0 : i32, i32
  }
  func.func @transform_11(%arg0: i32) -> (i32, i32) {
    %c0_i32 = arith.constant 0 : i32
    %c0_i32_0 = arith.constant 0 : i32
    %c0_i32_1 = arith.constant 0 : i32
    return %c0_i32, %c0_i32_0 : i32, i32
  }
  func.func @transform_12(%arg0: i32) -> (i32, i32) {
    %c0_i32 = arith.constant 0 : i32
    %c0_i32_0 = arith.constant 0 : i32
    %c0_i32_1 = arith.constant 0 : i32
    return %c0_i32, %c0_i32_0 : i32, i32
  }
  func.func @transform_13(%arg0: i32) -> (i32, i32) {
    %c0_i32 = arith.constant 0 : i32
    %c0_i32_0 = arith.constant 0 : i32
    %c0_i32_1 = arith.constant 0 : i32
    return %c0_i32, %c0_i32_0 : i32, i32
  }
  func.func @transform_14(%arg0: i32) -> (i32, i32) {
    %c0_i32 = arith.constant 0 : i32
    %c0_i32_0 = arith.constant 0 : i32
    %c0_i32_1 = arith.constant 0 : i32
    return %c0_i32, %c0_i32_0 : i32, i32
  }
  func.func @transform_15(%arg0: i32) -> (i32, i32) {
    %c0_i32 = arith.constant 0 : i32
    %c0_i32_0 = arith.constant 0 : i32
    %c0_i32_1 = arith.constant 0 : i32
    return %c0_i32, %c0_i32_0 : i32, i32
  }
  func.func @transform_16(%arg0: i32) -> (i32, i32) {
    %c0_i32 = arith.constant 0 : i32
    %c0_i32_0 = arith.constant 0 : i32
    %c0_i32_1 = arith.constant 0 : i32
    return %c0_i32, %c0_i32_0 : i32, i32
  }
  func.func @transform_17(%arg0: i32) -> (i32, i32) {
    %c0_i32 = arith.constant 0 : i32
    %c0_i32_0 = arith.constant 0 : i32
    %c0_i32_1 = arith.constant 0 : i32
    return %c0_i32, %c0_i32_0 : i32, i32
  }
  func.func @transform_18(%arg0: i32) -> (i32, i32) {
    %c0_i32 = arith.constant 0 : i32
    %c0_i32_0 = arith.constant 0 : i32
    %c0_i32_1 = arith.constant 0 : i32
    return %c0_i32, %c0_i32_0 : i32, i32
  }
  func.func @transform_19(%arg0: i32) -> (i32, i32) {
    %c0_i32 = arith.constant 0 : i32
    %c0_i32_0 = arith.constant 0 : i32
    %c0_i32_1 = arith.constant 0 : i32
    return %c0_i32, %c0_i32_0 : i32, i32
  }
  func.func @transform_20(%arg0: i32) -> (i32, i32) {
    %c0_i32 = arith.constant 0 : i32
    %c0_i32_0 = arith.constant 0 : i32
    %c0_i32_1 = arith.constant 0 : i32
    return %c0_i32, %c0_i32_0 : i32, i32
  }
  func.func @transform_21(%arg0: i32) -> (i32, i32, i32) {
    %c0_i32 = arith.constant 0 : i32
    %c0_i32_0 = arith.constant 0 : i32
    %c0_i32_1 = arith.constant 0 : i32
    return %arg0, %c0_i32, %c0_i32_0 : i32, i32, i32
  }
}

</mosaic_0001>

<bundles_post_ra>
// kernel: block_forward.1
= control target key start
LH: loop header
LB: loop body
LE: loop exit
PB: predicated region body
PF: predicated region fallthrough
CT: control target
= control target key end

     0   :  { %s3396_s0 = inlined_call_operand.vmem [shape: f32[2,8,32], index: 0, kind: input, shape index: {}]   ;;  %s3397_s1 = inlined_call_operand.vmem [shape: f32[1,32], index: 1, kind: input, shape index: {}]   ;;  %s3398_s2 = inlined_call_operand.vmem [shape: f32[1,32], index: 2, kind: input, shape index: {}]   ;;  %s3399_s3 = inlined_call_operand.vmem [shape: f32[32,64], index: 3, kind: input, shape index: {}]   ;;  %s3400_s4 = inlined_call_operand.vmem [shape: f32[32,64], index: 4, kind: input, shape index: {}]   ;;  %s3401_s5 = inlined_call_operand.vmem [shape: f32[4,64], index: 5, kind: input, shape index: {}]   ;;  %s3402_s6 = inlined_call_operand.vmem [shape: f32[1,64], index: 6, kind: input, shape index: {}]   ;;  %s3403_s7 = inlined_call_operand.vmem [shape: f32[64,128], index: 7, kind: input, shape index: {}]   ;;  %s3404_s8 = inlined_call_operand.vmem [shape: f32[64,16], index: 8, kind: input, shape index: {}]   ;;  %s3405_s9 = inlined_call_operand.vmem [shape: f32[64,16], index: 9, kind: input, shape index: {}]   ;;  %s3406_s10 = inlined_call_operand.vmem [shape: f32[128,64], index: 10, kind: input, shape index: {}]   ;;  %s3407_s11 = inlined_call_operand.vmem [shape: f32[1,64], index: 11, kind: input, shape index: {}]   ;;  %s3408_s12 = inlined_call_operand.vmem [shape: f32[16,64], index: 12, kind: input, shape index: {}]   ;;  %s3409_s13 = inlined_call_operand.vmem [shape: f32[1,64], index: 13, kind: input, shape index: {}]   ;;  %s3410_s14 = inlined_call_operand.vmem [shape: f32[64,32], index: 14, kind: input, shape index: {}]   ;;  %s3411_s15 = inlined_call_operand.vmem [shape: f32[1,32], index: 15, kind: input, shape index: {}]   ;;  %s3412_s16 = inlined_call_operand.vmem [shape: f32[1,32], index: 16, kind: input, shape index: {}]   ;;  %s3413_s17 = inlined_call_operand.vmem [shape: f32[32,128], index: 17, kind: input, shape index: {}]   ;;  %s3414_s18 = inlined_call_operand.vmem [shape: f32[1,128], index: 18, kind: input, shape index: {}]   ;;  %s3415_s19 = inlined_call_operand.vmem [shape: f32[128,32], index: 19, kind: input, shape index: {}]   ;;  %s3416_s20 = inlined_call_operand.vmem [shape: f32[1,32], index: 20, kind: input, shape index: {}]   ;;  %s3417_s21 = inlined_call_operand.hbm [shape: f32[2,8,32], index: 21, kind: output, shape index: {}]  }
   0x1   :  { %3428 = sst [smem:[#allocation17_spill]] %s3396_s0 }
   0x2   :  { %3429 = sst [smem:[#allocation18_spill]] %s3397_s1 }
   0x3   :  { %3430 = sst [smem:[#allocation19_spill]] %s3398_s2 }
   0x4   :  { %3431 = sst [smem:[#allocation20_spill]] %s3399_s3 }
   0x5   :  { %3432 = sst [smem:[#allocation21_spill]] %s3400_s4 }
   0x6   :  { %3433 = sst [smem:[#allocation22_spill]] %s3401_s5 }
   0x7   :  { %3434 = sst [smem:[#allocation23_spill]] %s3402_s6 }
   0x8   :  { %3435 = sst [smem:[#allocation24_spill]] %s3403_s7 }
   0x9   :  { %26 = vsyncpa [#allocation9], 0 }
   0xa   :  { %28 = vsyncpa [#allocation9 + $0x1], 0  ;;  %s2651_s2 = smov 0   ;;  %s2653_s25 = smov 0  }
   0xb   :  { %s2655_s26 = smov 0   ;;  %s2657_s27 = smov 0  }
   0xc LB: > { %3436 = sst [smem:[#allocation11_spill]] %s2524_s2  ;;  %s2672_s3 = sadd.s32 4294967295, %s2536_s27   ;;  %s2536_s27 = sphi %s2657_s27, %s3461_s27   ;;  %s2532_s26 = sphi %s2655_s26, %s3463_s26   ;;  %s2528_s25 = sphi %s2653_s25, %s3465_s25   ;;  %s2524_s2 = sphi %s2651_s2, %s3464_s2  }
   0xd   : > { %3437 = sst [smem:[#allocation12_spill]] %s2532_s26  ;;  %s2090_s28 = sadd.s32 4294967294, %s2536_s27  }
   0xe   : > { %3438 = sst [smem:[#allocation13_spill]] %s2536_s27  ;;  %s2676_s29 = sadd.s32 1, %s2536_s27  }
   0xf   : > { %3439 = sst [smem:[#allocation14_spill]] %s2676_s29  ;;  %s487_s0 = sadd.s32 1, %s2532_s26 }
  0x10   : > { %s484_s4 = ssub.s32 %s2536_s27, %s2676_s29  ;;  %p497_p0 = scmp.ne.s32.totalorder %s2532_s26, %s2528_s25 }
  0x11   : > { %p485_p1 = scmp.eq.s32.totalorder %s484_s4, 0  ;;  %p498_p2 = scmp.eq.s32.totalorder %s2672_s3, 1 }
  0x12   : > { %p503_p3 = scmp.ne.s32.totalorder %s2528_s25, %s2524_s2  ;;  %p504_p4 = scmp.eq.s32.totalorder %s2090_s28, 1 }
  0x13   : > { %s2687_s30 = scalar_select %p485_p1, %s2532_s26, %s487_s0  }
  0x14   : > { %p2689_p5 = por %p498_p2, %p497_p0  ;;  %p2693_p6 = por %p504_p4, %p503_p3 }
  0x15   : > { %3440 = sst [smem:[#allocation15_spill]] %s2687_s30  ;;  %p2093_p7 = scmp.ge.s32.totalorder %s2536_s27, 1 }
  0x16   : > { %s3442_s22 = scalar_select %p2693_p6, 1, 0 }
  0x17   : > { %p589_p8 = scmp.lt.s32.totalorder %s2536_s27, 3 }
  0x18   : > { %3443 = sst [smem:[#allocation16_spill]] %s3442_s22 }
  0x19   : > { %p590_p9 = pnand %p2093_p7, %p589_p8 }
  0x1a   : > { %p648_p10 = scmp.lt.s32.totalorder (!%p590_p9), %s2672_s3, 1  ;;  %s3444_s0 = sld [smem:[#allocation17_spill]] (!%p590_p9) }
  0x1b   : > { %593 = sbr.rel (%p590_p9) target bundleno = 2021 (0x7e5), region = 104  ;;  %s3445_s26 = sld [smem:[#allocation20_spill]] (!%p590_p9) }
  0x1c   : > { %s3447_s24 = sld [smem:[#allocation18_spill]] (!%p590_p9)  ;;  %s645_s2 = sand.u32 (!%p590_p9), 1, %s2528_s25  }
  0x1d   : > { %s3449_s22 = sld [smem:[#allocation21_spill]] (!%p590_p9)  ;;  %s2094_s27 = sshll.u32 (!%p590_p9), %s645_s2, 3 }
  0x1e   : > { %s3450_s7 = sld [smem:[#allocation24_spill]] (!%p590_p9) }
  0x1f   : > { %s3453_s6 = sld [smem:[#allocation23_spill]] (!%p590_p9) }
  0x20   : > { %s649_s23 = scalar_select %p648_p10, %s2672_s3, 1  ;;  %vm655_vm0 = vcmask 261120   ;;  %v2538_v8 = vmov 0.0   ;;  %vm2539_vm1 = vmmov 0   ;;  %vm835_vm2 = vcmask 518144   ;;  %v974_v26 = vld [vmem:[%s3404_s8 + $0x38] sm:$0xff] }
  0x21   : > { %s3446_s29 = smov %s3445_s26  ;;  %v687_v7 = vld [vmem:[%s3445_s26 + $0x18] sm:$0xff]  ;;  %2207 = vmatprep.subr.mxu0 %v2538_v8  ;;  %2215 = vmatprep.mubr.msk.f32.mxu0 %vm2539_vm1, %v2538_v8  ;;  %s3448_s26 = sld [smem:[#allocation19_spill]]  ;;  %836 = vst.msk [vmem:[#allocation2] sm:$0x7] %vm835_vm2, %v2538_v8  ;;  %v973_v28 = vld [vmem:[%s3404_s8 + $0x30] sm:$0xff]  ;;  %v972_v30 = vld [vmem:[%s3404_s8 + $0x28] sm:$0xff] }
  0x22   : > { %s2095_s1 = sshll.u32 %s649_s23, 3  ;;  %v686_v9 = vld [vmem:[%s3446_s29 + $0x10] sm:$0xff]  ;;  %2208 = vmatpush3.msra.mxu0 %v687_v7  ;;  %2248 = vmatprep.subr.mxu1 %v2538_v8  ;;  %v685_v10 = vld [vmem:[%s3446_s29 + $0x8] sm:$0xff]  ;;  %v684_v11 = vld [vmem:[%s3446_s29] sm:$0xff]  ;;  %vm837_vm3 = vcmask 523264   ;;  %vm1236_vm4 = vcmask 130048  }
  0x23   : > { %s2704_s4 = scalar_lea.vmem %s3444_s0, %s2095_s1  ;;  %2209 = vmatprep.subr.mxu0 %v2538_v8  ;;  %2264 = vmatprep.mubr.msk.f32.mxu1 %vm2539_vm1, %v2538_v8  ;;  %v2096_v16 = vld [vmem:[%s3447_s24] ss:$0 sm:$0xff]  ;;  %v764_v21 = vld [vmem:[%s3449_s22 + $0x18] sm:$0xff]  ;;  %v763_v22 = vld [vmem:[%s3449_s22 + $0x10] sm:$0xff]  ;;  %vm1693_vm9 = vcmask 1040384   ;;  %vm1695_vm10 = vcmask 1041408  }
  0x24   : > { %v652_v0 = vld [vmem:[%s2704_s4] sm:$0xff]  ;;  %2210 = vmatpush3.msra.mxu0 %v686_v9  ;;  %v762_v23 = vld [vmem:[%s3449_s22 + $0x8] sm:$0xff]  ;;  %v893_v25 = vld [vmem:[%s3450_s7 + $0x38] sm:$0xff]  ;;  %2249 = vmatpush3.msra.mxu1 %v974_v26  ;;  %vm1697_vm11 = vcmask 1042432   ;;  %vm1699_vm12 = vcmask 1043456   ;;  %vm1701_vm13 = vcmask 1044480  }
  0x25   : > { %v656_v1 = vsel %vm655_vm0, %v652_v0, 0.0  ;;  %2211 = vmatprep.subr.mxu0 %v2538_v8  ;;  %v761_v24 = vld [vmem:[%s3449_s22] sm:$0xff]  ;;  %v892_v27 = vld [vmem:[%s3450_s7 + $0x30] sm:$0xff]  ;;  %2250 = vmatprep.subr.mxu1 %v2538_v8  ;;  %v891_v29 = vld [vmem:[%s3450_s7 + $0x28] sm:$0xff]  ;;  %vm1703_vm14 = vcmask 1045504   ;;  %vm1705_vm15 = vcmask 1046528  }
  0x26   : > { %657 = vadd.xlane.f32.xlu0 %v656_v1  ;;  %2212 = vmatpush3.msra.mxu0 %v685_v10  ;;  %v890_v31 = vld [vmem:[%s3450_s7 + $0x20] sm:$0xff]  ;;  %v889_v33 = vld [vmem:[%s3450_s7 + $0x18] sm:$0xff]  ;;  %v888_v35 = vld [vmem:[%s3450_s7 + $0x10] sm:$0xff]  ;;  %s647_s23 = scalar_lea.vmem [#allocation8], %s2094_s27 }
  0x27   : > { %2213 = vmatprep.subr.mxu0 %v2538_v8  ;;  %v2097_v18 = vld [vmem:[%s3448_s26] ss:$0 sm:$0xff]  ;;  %2251 = vmatpush3.msra.mxu1 %v973_v28  ;;  %v970_v34 = vld [vmem:[%s3404_s8 + $0x18] sm:$0xff]  ;;  %v969_v36 = vld [vmem:[%s3404_s8 + $0x10] sm:$0xff]  ;;  %s3451_s26 = sld [smem:[#allocation22_spill]]  ;;  %v1241_v28 = vlaneseq }
  0x28   : > { %2214 = vmatpush3.msra.mxu0 %v684_v11  ;;  %2252 = vmatprep.subr.mxu1 %v2538_v8  ;;  %v971_v32 = vld [vmem:[%s3404_s8 + $0x20] sm:$0xff]  ;;  %v887_v37 = vld [vmem:[%s3450_s7 + $0x8] sm:$0xff] }
  0x29   : > { %2218 = vmatprep.subr.mxu0 %v2538_v8  ;;  %2253 = vmatpush3.msra.mxu1 %v972_v30  ;;  %v968_v38 = vld [vmem:[%s3404_s8 + $0x8] sm:$0xff]  ;;  %v886_v39 = vld [vmem:[%s3450_s7] sm:$0xff] }
  0x2a   : > { %2254 = vmatprep.subr.mxu1 %v2538_v8  ;;  %v967_v40 = vld [vmem:[%s3404_s8] sm:$0xff]  ;;  %v1050_v7 = vld [vmem:[%s3405_s9 + $0x28] sm:$0xff] }
  0x2b   : > { %2255 = vmatpush3.msra.mxu1 %v971_v32  ;;  %v2100_v46 = vld [vmem:[%s3453_s6] ss:$0 sm:$0xff]  ;;  %v1136_v9 = vld [vmem:[%s3406_s10 + $0x68] sm:$0xff]  ;;  %s2018_s6 = scalar_lea.sflag [#allocation9], %s645_s2 }
  0x2c   : > { %2256 = vmatprep.subr.mxu1 %v2538_v8  ;;  %v1049_v10 = vld [vmem:[%s3405_s9 + $0x20] sm:$0xff]  ;;  %v1124_v26 = vld [vmem:[%s3406_s10 + $0x8] sm:$0xff] }
  0x2d   : > { %2257 = vmatpush3.msra.mxu1 %v970_v34  ;;  %s3452_s30 = smov %s3451_s26  ;;  %v2101_v43 = vld [vmem:[%s3451_s26] ss:$0 sm:$0xff]  ;;  %v1245_v34 = vand.u32 127, %v1241_v28  ;;  %s2119_s26 = sshll.u32 %s2672_s3, 7 }
  0x2e   : > { %2258 = vmatprep.subr.mxu1 %v2538_v8  ;;  %v2102_v44 = vld [vmem:[%s3452_s30 + $0x1] ss:$0 sm:$0xff]  ;;  %v2103_v51 = vld [vmem:[%s3452_s30 + $0x2] ss:$0 sm:$0xff]  ;;  %v2104_v55 = vld [vmem:[%s3452_s30 + $0x3] ss:$0 sm:$0xff]  ;;  %s2029_s24 = scalar_lea.hbm %s3417_s21, %s2119_s26 }
  0x2f   : > { %2259 = vmatpush3.msra.mxu1 %v969_v36  ;;  %v1135_v11 = vld [vmem:[%s3406_s10 + $0x60] sm:$0xff]  ;;  %s2540_s3 = smov [#allocation8]  }
  0x30   : > { %2260 = vmatprep.subr.mxu1 %v2538_v8  ;;  %s2480_s27 = sshll.u32 %s2540_s3, 4  ;;  %s2481_s27 = int_to_ptr.vmem [resolvable:$false] %s2480_s27 }
  0x31   : > { %2261 = vmatpush3.msra.mxu1 %v968_v38  ;;  %s2482_s28 = scalar_lea.vmem %s2481_s27, 256 }
  0x32   : > { %2262 = vmatprep.subr.mxu1 %v2538_v8 }
  0x33   : > { %2263 = vmatpush3.msra.mxu1 %v967_v40 }
  0x34   : > { %2286 = vmatprep.subr.mxu1 %v2538_v8 }
  0xaf   : > { %v658_v2 = vpop.xlane.xlu0 %657 }
  0xb0   : > { %v660_v3 = vmul.f32 0.03125, %v658_v2 }
  0xb2   : > { %v661_v4 = vsub.f32 %v652_v0, %v660_v3  ;;  %v1052_v3 = vld [vmem:[%s3405_s9 + $0x38] sm:$0xff] }
  0xb4   : > { %v662_v5 = vmul.f32 %v661_v4, %v661_v4 }
  0xb6   : > { %v663_v6 = vsel %vm655_vm0, %v662_v5, 0.0  ;;  %v1051_v5 = vld [vmem:[%s3405_s9 + $0x30] sm:$0xff] }
  0xb7   : > { %664 = vadd.xlane.f32.xlu0 %v663_v6  ;;  %v1137_v6 = vld [vmem:[%s3406_s10 + $0x70] sm:$0xff] }
 0x140   : > { %v665_v12 = vpop.xlane.xlu0 %664 }
 0x141   : > { %v666_v13 = vmul.f32 0.03125, %v665_v12  ;;  %v1048_v12 = vld [vmem:[%s3405_s9 + $0x18] sm:$0xff] }
 0x143   : > { %v667_v14 = vadd.f32 1e-05, %v666_v13  ;;  %v1134_v13 = vld [vmem:[%s3406_s10 + $0x58] sm:$0xff] }
 0x145   : > { %2427 = vrsqrt.f32 %v667_v14  ;;  %v1047_v14 = vld [vmem:[%s3405_s9 + $0x10] sm:$0xff] }
 0x152   : > { %v2428_v15 = vpop.eup %2427 }
 0x153   : > { %v669_v17 = vmul.f32 %v2428_v15, %v661_v4  ;;  %v1138_v4 = vld [vmem:[%s3406_s10 + $0x78] sm:$0xff]  ;;  %v1133_v15 = vld [vmem:[%s3406_s10 + $0x50] sm:$0xff] }
 0x155   : > { %v676_v19 = vmul.f32 %v2096_v16, %v669_v17  ;;  %v1046_v16 = vld [vmem:[%s3405_s9 + $0x8] sm:$0xff] }
 0x156   : > { %v1132_v17 = vld [vmem:[%s3406_s10 + $0x48] sm:$0xff] }
 0x157   : > { %v683_v20 = vadd.f32 %v2097_v18, %v676_v19  ;;  %v1045_v18 = vld [vmem:[%s3405_s9] sm:$0xff] }
 0x158   : > { %v1131_v19 = vld [vmem:[%s3406_s10 + $0x40] sm:$0xff] }
 0x159   : > { %2216 = vmatmul.mubr.msk.f32.vlgmr.msra.gmra.mxu0 %vm655_vm0, %v683_v20 }
 0x15a   : > { %2219 = vmatpush3.msra.mxu0 %v764_v21  ;;  %2226 = vmatprep.mubr.msk.f32.mxu0 %vm2539_vm1, %v2538_v8  ;;  %v1129_v21 = vld [vmem:[%s3406_s10 + $0x30] sm:$0xff] }
 0x15b   : > { %2220 = vmatprep.subr.mxu0 %v2538_v8 }
 0x15c   : > { %2221 = vmatpush3.msra.mxu0 %v763_v22  ;;  %v1128_v22 = vld [vmem:[%s3406_s10 + $0x28] sm:$0xff] }
 0x15d   : > { %2222 = vmatprep.subr.mxu0 %v2538_v8 }
 0x15e   : > { %2223 = vmatpush3.msra.mxu0 %v762_v23  ;;  %v1127_v23 = vld [vmem:[%s3406_s10 + $0x20] sm:$0xff] }
 0x15f   : > { %2224 = vmatprep.subr.mxu0 %v2538_v8 }
 0x160   : > { %2225 = vmatpush3.msra.mxu0 %v761_v24  ;;  %v1126_v24 = vld [vmem:[%s3406_s10 + $0x18] sm:$0xff] }
 0x161   : > { %2227 = vmatmul.mubr.msk.f32.vlgmr.msra.gmra.mxu0 %vm655_vm0, %v683_v20  ;;  %2229 = vmatprep.subr.mxu0 %v2538_v8  ;;  %v1130_v20 = vld [vmem:[%s3406_s10 + $0x38] sm:$0xff] }
 0x162   : > { %2245 = vmatprep.mubr.msk.f32.mxu0 %vm2539_vm1, %v2538_v8  ;;  %2230 = vmatpush3.msra.mxu0 %v893_v25  ;;  %v1125_v25 = vld [vmem:[%s3406_s10 + $0x10] sm:$0xff] }
 0x163   : > { %2231 = vmatprep.subr.mxu0 %v2538_v8 }
 0x164   : > { %2232 = vmatpush3.msra.mxu0 %v892_v27  ;;  %v1123_v27 = vld [vmem:[%s3406_s10] sm:$0xff] }
 0x165   : > { %2233 = vmatprep.subr.mxu0 %v2538_v8 }
 0x166   : > { %2234 = vmatpush3.msra.mxu0 %v891_v29 }
 0x167   : > { %2235 = vmatprep.subr.mxu0 %v2538_v8 }
 0x168   : > { %2236 = vmatpush3.msra.mxu0 %v890_v31  ;;  %v1242_v31 = vshrl.u32 %v1241_v28, 7 }
 0x169   : > { %2237 = vmatprep.subr.mxu0 %v2538_v8 }
 0x16a   : > { %2238 = vmatpush3.msra.mxu0 %v889_v33  ;;  %v2959_v36 = vsub.s32 0, %v1242_v31  ;;  %v1243_v38 = vadd.s32 8, %v1242_v31  ;;  %vm2963_vm5 = vcmp.eq.s32.totalorder %v1242_v31, %v1245_v34 }
 0x16b   : > { %2239 = vmatprep.subr.mxu0 %v2538_v8 }
 0x16c   : > { %2240 = vmatpush3.msra.mxu0 %v888_v35  ;;  %v2957_v35 = vsub.s32 1, %v1242_v31  ;;  %vm2972_vm6 = vcmp.eq.s32.totalorder %v1243_v38, %v1245_v34 }
 0x16d   : > { %2241 = vmatprep.subr.mxu0 %v2538_v8 }
 0x16e   : > { %2242 = vmatpush3.msra.mxu0 %v887_v37  ;;  %v2961_v37 = vsub.s32 2, %v1242_v31 }
 0x16f   : > { %2243 = vmatprep.subr.mxu0 %v2538_v8 }
 0x170   : > { %2244 = vmatpush3.msra.mxu0 %v886_v39  ;;  %v2109_v39 = vld [vmem:[%s3407_s11] ss:$0 sm:$0xff] }
 0x171   : > { %2267 = vmatprep.subr.mxu0 %v2538_v8 }
 0x219   : > { %v757_v41 = vpop.f32.mrf.mxu0 }
 0x21a   : > { %838 = vst.msk [vmem:[#allocation2 + $0x3] sm:$0xff] %vm837_vm3, %v757_v41 }
 0x21b   : > { %v2217_v42 = vpop.f32.mrf.mxu0 }
 0x221   : > { %v2831_v45 = vpop.f32.mrf.mxu0  ;;  %v848_v47 = vld [vmem:[#allocation2] sm:$0xff] }
 0x222   : > { %v856_v48 = vld [vmem:[#allocation2 + $0x1] sm:$0xff]  ;;  %v853_v49 = vmul.f32 %v2101_v43, %v848_v47 }
 0x223   : > { %v2228_v50 = vpop.f32.mrf.mxu0  ;;  %v864_v52 = vld [vmem:[#allocation2 + $0x2] sm:$0xff]  ;;  %v861_v54 = vmul.f32 %v2102_v44, %v856_v48  ;;  %v2970_v44 = vsub.s32 3, %v1242_v31 }
 0x224   : > { %v854_v53 = vadd.f32 %v2100_v46, %v853_v49  ;;  %v872_v56 = vld [vmem:[#allocation2 + $0x3] sm:$0xff]  ;;  %v869_v58 = vmul.f32 %v2103_v51, %v864_v52 }
 0x225   : > { %v877_v60 = vmul.f32 %v2104_v55, %v872_v56  ;;  %v1731_v46 = vld [vmem:[%s3410_s14 + $0x28] sm:$0xff] }
 0x226   : > { %v862_v57 = vadd.f32 %v861_v54, %v854_v53  ;;  %v2987_v54 = vsub.s32 4, %v1242_v31 }
 0x228   : > { %v870_v59 = vadd.f32 %v869_v58, %v862_v57 }
 0x22a   : > { %v878_v61 = vadd.f32 %v877_v60, %v870_v59 }
 0x22c   : > { %v2105_v62 = vmul.f32 -1.442695, %v878_v61 }
 0x22e   : > { %2429 = vpow2.f32 %v2105_v62 }
 0x23b   : > { %v2430_v63 = vpop.eup %2429 }
 0x23c   : > { %v882_v0 = vadd.f32 1.0, %v2430_v63 }
 0x23e   : > { %2431 = vrcp.f32 %v882_v0 }
 0x24b   : > { %v2432_v1 = vpop.eup %2431 }
 0x24c   : > { %v2842_v2 = vmul.f32 %v2432_v1, %v878_v61  ;;  %v2997_v61 = vsub.s32 5, %v1242_v31 }
 0x24e   : > { %2246 = vmatmul.mubr.msk.f32.vlgmr.msra.gmra.mxu0 %vm837_vm3, %v2842_v2  ;;  %1235 = vst.msk [vmem:[#allocation4] sm:$0xff] %vm837_vm3, %v2842_v2  ;;  %2265 = vmatmul.mubr.msk.f32.vlgmr.msra.gmra.mxu1 %vm837_vm3, %v2842_v2 }
 0x24f   : > { %2268 = vmatpush3.msra.mxu0 %v1052_v3  ;;  %2283 = vmatprep.mubr.msk.f32.mxu0 %vm2539_vm1, %v2538_v8 }
 0x250   : > { %2269 = vmatprep.subr.mxu0 %v2538_v8  ;;  %2287 = vmatpush3.msra.mxu1 %v1138_v4 }
 0x251   : > { %2270 = vmatpush3.msra.mxu0 %v1051_v5  ;;  %2288 = vmatprep.subr.mxu1 %v2538_v8  ;;  %v3006_v5 = vsub.s32 6, %v1242_v31 }
 0x252   : > { %2271 = vmatprep.subr.mxu0 %v2538_v8  ;;  %2289 = vmatpush3.msra.mxu1 %v1137_v6 }
 0x253   : > { %2272 = vmatpush3.msra.mxu0 %v1050_v7  ;;  %2290 = vmatprep.subr.mxu1 %v2538_v8 }
 0x254   : > { %2273 = vmatprep.subr.mxu0 %v2538_v8  ;;  %2291 = vmatpush3.msra.mxu1 %v1136_v9 }
 0x255   : > { %2274 = vmatpush3.msra.mxu0 %v1049_v10  ;;  %2292 = vmatprep.subr.mxu1 %v2538_v8 }
 0x256   : > { %2275 = vmatprep.subr.mxu0 %v2538_v8  ;;  %2293 = vmatpush3.msra.mxu1 %v1135_v11 }
 0x257   : > { %2276 = vmatpush3.msra.mxu0 %v1048_v12  ;;  %2294 = vmatprep.subr.mxu1 %v2538_v8  ;;  %v3015_v12 = vsub.s32 7, %v1242_v31 }
 0x258   : > { %2277 = vmatprep.subr.mxu0 %v2538_v8  ;;  %2295 = vmatpush3.msra.mxu1 %v1134_v13 }
 0x259   : > { %2278 = vmatpush3.msra.mxu0 %v1047_v14  ;;  %2296 = vmatprep.subr.mxu1 %v2538_v8 }
 0x25a   : > { %2279 = vmatprep.subr.mxu0 %v2538_v8  ;;  %2297 = vmatpush3.msra.mxu1 %v1133_v15 }
 0x25b   : > { %2280 = vmatpush3.msra.mxu0 %v1046_v16  ;;  %2298 = vmatprep.subr.mxu1 %v2538_v8 }
 0x25c   : > { %2281 = vmatprep.subr.mxu0 %v2538_v8  ;;  %2299 = vmatpush3.msra.mxu1 %v1132_v17 }
 0x25d   : > { %2282 = vmatpush3.msra.mxu0 %v1045_v18  ;;  %2300 = vmatprep.subr.mxu1 %v2538_v8 }
 0x25e   : > { %2284 = vmatmul.mubr.msk.f32.vlgmr.msra.gmra.mxu0 %vm837_vm3, %v2842_v2  ;;  %2301 = vmatpush3.msra.mxu1 %v1131_v19 }
 0x25f   : > { %2302 = vmatprep.subr.mxu1 %v2538_v8  ;;  %2318 = vmatprep.mubr.msk.f32.mxu1 %vm2539_vm1, %v2538_v8 }
 0x260   : > { %2303 = vmatpush3.msra.mxu1 %v1130_v20  ;;  %2321 = vmatprep.subr.mxu0 %v2538_v8 }
 0x261   : > { %2304 = vmatprep.subr.mxu1 %v2538_v8  ;;  %2337 = vmatprep.mubr.msk.f32.mxu0 %vm2539_vm1, %v2538_v8 }
 0x262   : > { %2305 = vmatpush3.msra.mxu1 %v1129_v21 }
 0x263   : > { %2306 = vmatprep.subr.mxu1 %v2538_v8 }
 0x264   : > { %2307 = vmatpush3.msra.mxu1 %v1128_v22 }
 0x265   : > { %2308 = vmatprep.subr.mxu1 %v2538_v8 }
 0x266   : > { %2309 = vmatpush3.msra.mxu1 %v1127_v23 }
 0x267   : > { %2310 = vmatprep.subr.mxu1 %v2538_v8 }
 0x268   : > { %2311 = vmatpush3.msra.mxu1 %v1126_v24 }
 0x269   : > { %2312 = vmatprep.subr.mxu1 %v2538_v8 }
 0x26a   : > { %2313 = vmatpush3.msra.mxu1 %v1125_v25 }
 0x26b   : > { %2314 = vmatprep.subr.mxu1 %v2538_v8 }
 0x26c   : > { %2315 = vmatpush3.msra.mxu1 %v1124_v26 }
 0x26d   : > { %2316 = vmatprep.subr.mxu1 %v2538_v8 }
 0x26e   : > { %2317 = vmatpush3.msra.mxu1 %v1123_v27 }
 0x26f   : > { %2351 = vmatprep.subr.mxu1 %v2538_v8 }
 0x30e   : > { %v963_v29 = vpop.f32.mrf.mxu0  ;;  %v1041_v30 = vpop.f32.mrf.mxu1 }
 0x30f   : > { %1237 = vst.msk [vmem:[#allocation6] sm:$0xff] %vm1236_vm4, %v1041_v30  ;;  %2319 = vmatmul.mubr.f32.vlgmr.msra.gmra.mxu1 %v963_v29 }
 0x310   : > { %v2247_v32 = vpop.f32.mrf.mxu0  ;;  %v2266_v33 = vpop.f32.mrf.mxu1  ;;  %2383 = vmatprep.mubr.msk.f32.mxu1 %vm2539_vm1, %v2538_v8 }
 0x316   : > { %v1250_v40 = vld [vmem:[#allocation6] sm:$0xff] }
 0x317   : > { %v1311_v41 = vrot.slane %v1250_v40, %v2957_v35  ;;  %v1256_v42 = vrot.slane %v1250_v40, %v2959_v36  ;;  %v1366_v43 = vrot.slane %v1250_v40, %v2961_v37  ;;  %v1421_v53 = vrot.slane %v1250_v40, %v2970_v44 }
 0x318   : > { %v1476_v60 = vrot.slane %v1250_v40, %v2987_v54  ;;  %v1531_v4 = vrot.slane %v1250_v40, %v2997_v61  ;;  %v1586_v11 = vrot.slane %v1250_v40, %v3006_v5  ;;  %v1641_v17 = vrot.slane %v1250_v40, %v3015_v12 }
 0x319   : > { %v1312_v47 = vsel %vm2963_vm5, %v1311_v41, 0.0  ;;  %v1257_v48 = vsel %vm2963_vm5, %v1256_v42, 0.0  ;;  %v1367_v51 = vsel %vm2963_vm5, %v1366_v43, 0.0  ;;  %v1258_v52 = vsel %vm2972_vm6, %v1256_v42, 0.0 }
 0x31a   : > { %v1314_v49 = vsel %vm1236_vm4, %v1312_v47, 0.0  ;;  %v1259_v50 = vsel %vm1236_vm4, %v1257_v48, 0.0  ;;  %v1369_v56 = vsel %vm1236_vm4, %v1367_v51, 0.0  ;;  %v1262_v57 = vsel %vm1236_vm4, %v1258_v52, 0.0 }
 0x31b   : > { %1315 = vadd.xlane.f32.xlu0 %v1314_v49  ;;  %1260 = vadd.xlane.f32.xlu1 %v1259_v50  ;;  %v1422_v58 = vsel %vm2963_vm5, %v1421_v53, 0.0  ;;  %v1313_v59 = vsel %vm2972_vm6, %v1311_v41, 0.0  ;;  %v1477_v1 = vsel %vm2963_vm5, %v1476_v60, 0.0  ;;  %v1368_v3 = vsel %vm2972_vm6, %v1366_v43, 0.0 }
 0x31c   : > { %v1424_v63 = vsel %vm1236_vm4, %v1422_v58, 0.0  ;;  %v1317_v0 = vsel %vm1236_vm4, %v1313_v59, 0.0  ;;  %v1479_v6 = vsel %vm1236_vm4, %v1477_v1, 0.0  ;;  %v1372_v7 = vsel %vm1236_vm4, %v1368_v3, 0.0 }
 0x31d   : > { %v1532_v9 = vsel %vm2963_vm5, %v1531_v4, 0.0  ;;  %v1423_v10 = vsel %vm2972_vm6, %v1421_v53, 0.0  ;;  %v1587_v15 = vsel %vm2963_vm5, %v1586_v11, 0.0  ;;  %v1478_v16 = vsel %vm2972_vm6, %v1476_v60, 0.0 }
 0x31e   : > { %v1119_v55 = vpop.f32.mrf.mxu0  ;;  %v1534_v13 = vsel %vm1236_vm4, %v1532_v9, 0.0  ;;  %v1427_v14 = vsel %vm1236_vm4, %v1423_v10, 0.0  ;;  %v1589_v19 = vsel %vm1236_vm4, %v1587_v15, 0.0  ;;  %v1482_v20 = vsel %vm1236_vm4, %v1478_v16, 0.0 }
 0x31f   : > { %1238 = vst.msk [vmem:[#allocation7] sm:$0xff] %vm1236_vm4, %v1119_v55  ;;  %1370 = vadd.xlane.f32.xlu0 %v1369_v56  ;;  %1263 = vadd.xlane.f32.xlu1 %v1262_v57  ;;  %v1642_v21 = vsel %vm2963_vm5, %v1641_v17, 0.0  ;;  %v1533_v22 = vsel %vm2972_vm6, %v1531_v4, 0.0  ;;  %v1588_v26 = vsel %vm2972_vm6, %v1586_v11, 0.0  ;;  %v1643_v31 = vsel %vm2972_vm6, %v1641_v17, 0.0 }
 0x320   : > { %v2285_v62 = vpop.f32.mrf.mxu0  ;;  %v1644_v24 = vsel %vm1236_vm4, %v1642_v21, 0.0  ;;  %v1537_v25 = vsel %vm1236_vm4, %v1533_v22, 0.0  ;;  %v1592_v29 = vsel %vm1236_vm4, %v1588_v26, 0.0  ;;  %v1647_v34 = vsel %vm1236_vm4, %v1643_v31, 0.0 }
 0x323   : > { %1425 = vadd.xlane.f32.xlu0 %v1424_v63  ;;  %1318 = vadd.xlane.f32.xlu1 %v1317_v0 }
 0x326   : > { %v1251_v18 = vld [vmem:[#allocation7] sm:$0xff] }
 0x327   : > { %1480 = vadd.xlane.f32.xlu0 %v1479_v6  ;;  %1373 = vadd.xlane.f32.xlu1 %v1372_v7  ;;  %v1268_v23 = vrot.slane %v1251_v18, %v2959_v36  ;;  %v1323_v28 = vrot.slane %v1251_v18, %v2957_v35  ;;  %v1378_v33 = vrot.slane %v1251_v18, %v2961_v37 }
 0x328   : > { %v1433_v42 = vrot.slane %v1251_v18, %v2970_v44  ;;  %v1488_v50 = vrot.slane %v1251_v18, %v2987_v54  ;;  %v1543_v56 = vrot.slane %v1251_v18, %v2997_v61  ;;  %v1598_v62 = vrot.slane %v1251_v18, %v3006_v5 }
 0x329   : > { %v1269_v27 = vsel %vm2963_vm5, %v1268_v23, 0.0  ;;  %v1324_v32 = vsel %vm2963_vm5, %v1323_v28, 0.0  ;;  %v1270_v40 = vsel %vm2972_vm6, %v1268_v23, 0.0  ;;  %v1379_v41 = vsel %vm2963_vm5, %v1378_v33, 0.0  ;;  %v1730_v23 = vld [vmem:[%s3410_s14 + $0x20] sm:$0xff] }
 0x32a   : > { %v1271_v30 = vsel %vm1236_vm4, %v1269_v27, 0.0  ;;  %v1326_v38 = vsel %vm1236_vm4, %v1324_v32, 0.0  ;;  %v1274_v43 = vsel %vm1236_vm4, %v1270_v40, 0.0  ;;  %v1381_v47 = vsel %vm1236_vm4, %v1379_v41, 0.0  ;;  %v1728_v27 = vld [vmem:[%s3410_s14 + $0x10] sm:$0xff] }
 0x32b   : > { %1535 = vadd.xlane.f32.xlu0 %v1534_v13  ;;  %1428 = vadd.xlane.f32.xlu1 %v1427_v14  ;;  %v1325_v48 = vsel %vm2972_vm6, %v1323_v28, 0.0  ;;  %v1434_v49 = vsel %vm2963_vm5, %v1433_v42, 0.0  ;;  %v1380_v53 = vsel %vm2972_vm6, %v1378_v33, 0.0  ;;  %v1489_v55 = vsel %vm2963_vm5, %v1488_v50, 0.0 }
 0x32c   : > { %v1329_v51 = vsel %vm1236_vm4, %v1325_v48, 0.0  ;;  %v1436_v52 = vsel %vm1236_vm4, %v1434_v49, 0.0  ;;  %v1384_v57 = vsel %vm1236_vm4, %v1380_v53, 0.0  ;;  %v1491_v58 = vsel %vm1236_vm4, %v1489_v55, 0.0 }
 0x32d   : > { %v1435_v59 = vsel %vm2972_vm6, %v1433_v42, 0.0  ;;  %v1544_v60 = vsel %vm2963_vm5, %v1543_v56, 0.0  ;;  %v1490_v1 = vsel %vm2972_vm6, %v1488_v50, 0.0  ;;  %v1599_v3 = vsel %vm2963_vm5, %v1598_v62, 0.0 }
 0x32e   : > { %v1439_v63 = vsel %vm1236_vm4, %v1435_v59, 0.0  ;;  %v1546_v0 = vsel %vm1236_vm4, %v1544_v60, 0.0  ;;  %v1653_v4 = vrot.slane %v1251_v18, %v3015_v12  ;;  %v1494_v6 = vsel %vm1236_vm4, %v1490_v1, 0.0  ;;  %v1733_v18 = vld [vmem:[%s3410_s14 + $0x38] sm:$0xff]  ;;  %v3159_v1 = vld [vmem:[%s3408_s12] sm:$0xff] }
 0x32f   : > { %1590 = vadd.xlane.f32.xlu0 %v1589_v19  ;;  %1483 = vadd.xlane.f32.xlu1 %v1482_v20  ;;  %v1601_v7 = vsel %vm1236_vm4, %v1599_v3, 0.0  ;;  %v1545_v9 = vsel %vm2972_vm6, %v1543_v56, 0.0  ;;  %v1600_v14 = vsel %vm2972_vm6, %v1598_v62, 0.0  ;;  %v1732_v19 = vld [vmem:[%s3410_s14 + $0x30] sm:$0xff]  ;;  %v3164_v3 = vld [vmem:[%s3408_s12 + $0x8] sm:$0xff] }
 0x330   : > { %v1654_v10 = vsel %vm2963_vm5, %v1653_v4, 0.0  ;;  %v1549_v11 = vsel %vm1236_vm4, %v1545_v9, 0.0  ;;  %v1604_v15 = vsel %vm1236_vm4, %v1600_v14, 0.0  ;;  %v1655_v16 = vsel %vm2972_vm6, %v1653_v4, 0.0  ;;  %2322 = vmatpush3.msra.mxu0 %v1733_v18 }
 0x331   : > { %v1656_v13 = vsel %vm1236_vm4, %v1654_v10, 0.0  ;;  %v1659_v17 = vsel %vm1236_vm4, %v1655_v16, 0.0  ;;  %2323 = vmatprep.subr.mxu0 %v2538_v8 }
 0x332   : > { %2324 = vmatpush3.msra.mxu0 %v1732_v19 }
 0x333   : > { %1645 = vadd.xlane.f32.xlu0 %v1644_v24  ;;  %1538 = vadd.xlane.f32.xlu1 %v1537_v25  ;;  %v1729_v25 = vld [vmem:[%s3410_s14 + $0x18] sm:$0xff] }
 0x334   : > { %2325 = vmatprep.subr.mxu0 %v2538_v8 }
 0x335   : > { %2326 = vmatpush3.msra.mxu0 %v1731_v46 }
 0x336   : > { %2327 = vmatprep.subr.mxu0 %v2538_v8 }
 0x337   : > { %1593 = vadd.xlane.f32.xlu1 %v1592_v29  ;;  %1272 = vadd.xlane.f32.xlu0 %v1271_v30  ;;  %v1727_v29 = vld [vmem:[%s3410_s14 + $0x8] sm:$0xff]  ;;  %v1726_v30 = vld [vmem:[%s3410_s14] sm:$0xff] }
 0x338   : > { %2328 = vmatpush3.msra.mxu0 %v1730_v23 }
 0x339   : > { %2329 = vmatprep.subr.mxu0 %v2538_v8 }
 0x33a   : > { %2330 = vmatpush3.msra.mxu0 %v1729_v25 }
 0x33b   : > { %1648 = vadd.xlane.f32.xlu1 %v1647_v34  ;;  %1327 = vadd.xlane.f32.xlu0 %v1326_v38 }
 0x33c   : > { %2331 = vmatprep.subr.mxu0 %v2538_v8 }
 0x33d   : > { %2332 = vmatpush3.msra.mxu0 %v1728_v27  ;;  %v1249_v27 = vld [vmem:[#allocation4] sm:$0xff] }
 0x33e   : > { %2333 = vmatprep.subr.mxu0 %v2538_v8 }
 0x33f   : > { %1275 = vadd.xlane.f32.xlu1 %v1274_v43  ;;  %1382 = vadd.xlane.f32.xlu0 %v1381_v47 }
 0x340   : > { %2334 = vmatpush3.msra.mxu0 %v1727_v29 }
 0x341   : > { %2335 = vmatprep.subr.mxu0 %v2538_v8 }
 0x342   : > { %2336 = vmatpush3.msra.mxu0 %v1726_v30 }
 0x343   : > { %1330 = vadd.xlane.f32.xlu1 %v1329_v51  ;;  %1437 = vadd.xlane.f32.xlu0 %v1436_v52 }
 0x344   : > { %2340 = vmatprep.subr.mxu0 %v2538_v8 }
 0x347   : > { %1385 = vadd.xlane.f32.xlu1 %v1384_v57  ;;  %1492 = vadd.xlane.f32.xlu0 %v1491_v58 }
 0x34b   : > { %1440 = vadd.xlane.f32.xlu1 %v1439_v63  ;;  %1547 = vadd.xlane.f32.xlu0 %v1546_v0 }
 0x34f   : > { %1495 = vadd.xlane.f32.xlu1 %v1494_v6  ;;  %1602 = vadd.xlane.f32.xlu0 %v1601_v7 }
 0x353   : > { %1550 = vadd.xlane.f32.xlu1 %v1549_v11  ;;  %1657 = vadd.xlane.f32.xlu0 %v1656_v13 }
 0x357   : > { %1605 = vadd.xlane.f32.xlu1 %v1604_v15 }
 0x35b   : > { %1660 = vadd.xlane.f32.xlu1 %v1659_v17 }
 0x3a4   : > { %v3127_v31 = vpop.xlane.xlu1 %1260  ;;  %v3133_v33 = vpop.xlane.xlu0 %1315 }
 0x3a8   : > { %v3131_v32 = vpop.xlane.xlu1 %1263  ;;  %v3137_v41 = vpop.xlane.xlu0 %1370 }
 0x3ac   : > { %v3135_v38 = vpop.xlane.xlu1 %1318  ;;  %v3141_v47 = vpop.xlane.xlu0 %1425 }
 0x3b0   : > { %v3139_v42 = vpop.xlane.xlu1 %1373  ;;  %v3145_v52 = vpop.xlane.xlu0 %1480 }
 0x3b4   : > { %v3143_v48 = vpop.xlane.xlu1 %1428  ;;  %v3149_v62 = vpop.xlane.xlu0 %1535 }
 0x3b8   : > { %v3147_v57 = vpop.xlane.xlu1 %1483  ;;  %v3154_v0 = vpop.xlane.xlu0 %1590 }
 0x3bc   : > { %v3152_v63 = vpop.xlane.xlu1 %1538  ;;  %v3175_v16 = vpop.xlane.xlu0 %1645 }
 0x3c0   : > { %v3166_v6 = vpop.xlane.xlu1 %1593  ;;  %v3182_v23 = vpop.xlane.xlu0 %1272 }
 0x3c4   : > { %v3177_v18 = vpop.xlane.xlu1 %1648 }
 0x3c8   : > { %v3187_v30 = vpop.xlane.xlu1 %1275 }
 0x3cf   : > { %v1212_v20 = vpop.f32.mrf.mxu1 }
 0x3d0   : > { %v1213_v21 = vadd.f32 %v2109_v39, %v1212_v20 }
 0x3d1   : > { %v2320_v22 = vpop.f32.mrf.mxu1 }
 0x3d2   : > { %v1219_v24 = vand.u32 2147483647, %v1213_v21  ;;  %v1216_v56 = vmax.f32 %v1213_v21, 0.0  ;;  %vm1217_vm8 = vcmp.ne.f32.partialorder %v1213_v21, %v1213_v21 }
 0x3d4   : > { %v1220_v26 = vsub.f32 0.0, %v1219_v24 }
 0x3d6   : > { %v1221_v28 = vmul.f32 1.442695, %v1220_v26 }
 0x3d8   : > { %2433 = vpow2.f32 %v1221_v28 }
 0x3e5   : > { %v2434_v34 = vpop.eup %2433 }
 0x3e6   : > { %v1223_v40 = vadd.f32 1.0, %v2434_v34  ;;  %v1226_v43 = vmul.f32 -0.5, %v2434_v34  ;;  %v1229_v50 = vand.u32 2147483647, %v2434_v34 }
 0x3e8   : > { %2435 = vlog2.f32 %v1223_v40  ;;  %v1227_v49 = vadd.f32 1.0, %v1226_v43  ;;  %vm1230_vm7 = vcmp.lt.f32.partialorder %v1229_v50, 0.0004427343 }
 0x3ea   : > { %v1228_v55 = vmul.f32 %v2434_v34, %v1227_v49 }
 0x3f5   : > { %v2436_v51 = vpop.eup %2435 }
 0x3f6   : > { %v1225_v53 = vmul.f32 0.6931472, %v2436_v51 }
 0x3f8   : > { %v1231_v58 = vsel %vm1230_vm7, %v1228_v55, %v1225_v53  ;;  %v1328_v53 = vpop.xlane.xlu0 %1327 }
 0x3f9   : > { %v1232_v59 = vadd.f32 %v1231_v58, %v1216_v56  ;;  %v1331_v58 = vpop.xlane.xlu1 %1330 }
 0x3fb   : > { %v1233_v60 = vsel %vm1217_vm8, %v1213_v21, %v1232_v59 }
 0x3fc   : > { %1234 = vst.msk [vmem:[#allocation3] sm:$0xff] %vm837_vm3, %v1233_v60 }
 0x403   : > { %v1248_v4 = vld [vmem:[#allocation3] sm:$0xff] }
 0x404   : > { %v1280_v7 = vrot.slane %v1248_v4, %v2959_v36  ;;  %v1335_v9 = vrot.slane %v1248_v4, %v2957_v35  ;;  %v1390_v14 = vrot.slane %v1248_v4, %v2961_v37  ;;  %v1445_v46 = vrot.slane %v1248_v4, %v2970_v44 }
 0x405   : > { %v1500_v26 = vrot.slane %v1248_v4, %v2987_v54  ;;  %v3189_v34 = vmul.f32 %v1249_v27, %v1248_v4  ;;  %v1555_v49 = vrot.slane %v1248_v4, %v2997_v61  ;;  %v1610_v56 = vrot.slane %v1248_v4, %v3006_v5 }
 0x406   : > { %v1281_v10 = vmul.f32 %v1280_v7, %v3159_v1  ;;  %v1282_v11 = vmul.f32 %v1280_v7, %v3164_v3  ;;  %v1336_v13 = vmul.f32 %v1335_v9, %v3159_v1  ;;  %v1337_v15 = vmul.f32 %v1335_v9, %v3164_v3 }
 0x407   : > { %v1391_v20 = vmul.f32 %v1390_v14, %v3159_v1  ;;  %v1392_v22 = vmul.f32 %v1390_v14, %v3164_v3  ;;  %v1446_v25 = vmul.f32 %v1445_v46, %v3159_v1  ;;  %v1447_v29 = vmul.f32 %v1445_v46, %v3164_v3 }
 0x408   : > { %v1283_v17 = vmul.f32 1.442695, %v1281_v10  ;;  %v1285_v39 = vmul.f32 1.442695, %v1282_v11  ;;  %v1338_v19 = vmul.f32 1.442695, %v1336_v13  ;;  %v1501_v43 = vmul.f32 %v1500_v26, %v3159_v1 }
 0x409   : > { %v1340_v21 = vmul.f32 1.442695, %v1337_v15  ;;  %v1393_v24 = vmul.f32 1.442695, %v1391_v20  ;;  %v1395_v28 = vmul.f32 1.442695, %v1392_v22  ;;  %v1502_v51 = vmul.f32 %v1500_v26, %v3164_v3 }
 0x40a   : > { %2437 = vpow2.f32 %v1283_v17  ;;  %v1448_v40 = vmul.f32 1.442695, %v1446_v25  ;;  %v1450_v50 = vmul.f32 1.442695, %v1447_v29  ;;  %v1292_v55 = vrot.slane %v3189_v34, %v2959_v36 }
 0x40b   : > { %2439 = vpow2.f32 %v1285_v39  ;;  %v1503_v59 = vmul.f32 1.442695, %v1501_v43  ;;  %v1556_v60 = vmul.f32 %v1555_v49, %v3159_v1  ;;  %v1505_v9 = vmul.f32 1.442695, %v1502_v51 }
 0x40c   : > { %2441 = vpow2.f32 %v1338_v19  ;;  %v1557_v10 = vmul.f32 %v1555_v49, %v3164_v3  ;;  %v1293_v14 = vmul.f32 %v1292_v55, %v3127_v31  ;;  %v1347_v15 = vrot.slane %v3189_v34, %v2957_v35  ;;  %v1383_v19 = vpop.xlane.xlu0 %1382 }
 0x40d   : > { %2443 = vpow2.f32 %v1340_v21  ;;  %v1294_v17 = vmul.f32 %v1292_v55, %v3131_v32  ;;  %v1611_v39 = vmul.f32 %v1610_v56, %v3159_v1  ;;  %v1558_v46 = vmul.f32 1.442695, %v1556_v60  ;;  %v1386_v32 = vpop.xlane.xlu1 %1385 }
 0x40e   : > { %2445 = vpow2.f32 %v1393_v24  ;;  %v1665_v21 = vrot.slane %v1248_v4, %v3015_v12  ;;  %v1560_v25 = vmul.f32 1.442695, %v1557_v10  ;;  %v1348_v27 = vmul.f32 %v1347_v15, %v3133_v33 }
 0x40f   : > { %2447 = vpow2.f32 %v1395_v28  ;;  %v1402_v35 = vrot.slane %v3189_v34, %v2961_v37  ;;  %v1612_v28 = vmul.f32 %v1610_v56, %v3164_v3  ;;  %v1457_v4 = vrot.slane %v3189_v34, %v2970_v44 }
 0x410   : > { %2449 = vpow2.f32 %v1448_v40  ;;  %v1349_v40 = vmul.f32 %v1347_v15, %v3135_v38  ;;  %v1512_v43 = vrot.slane %v3189_v34, %v2987_v54  ;;  %v1666_v33 = vmul.f32 %v1665_v21, %v3159_v1 }
 0x411   : > { %2451 = vpow2.f32 %v1450_v50  ;;  %v1613_v50 = vmul.f32 1.442695, %v1611_v39  ;;  %v1667_v37 = vmul.f32 %v1665_v21, %v3164_v3  ;;  %v1403_v38 = vmul.f32 %v1402_v35, %v3137_v41  ;;  %v1441_v1 = vpop.xlane.xlu1 %1440 }
 0x412   : > { %2453 = vpow2.f32 %v1503_v59  ;;  %v1438_v59 = vpop.xlane.xlu0 %1437  ;;  %v1458_v54 = vmul.f32 %v1457_v4, %v3141_v47 }
 0x413   : > { %2455 = vpow2.f32 %v1505_v9  ;;  %v1404_v9 = vmul.f32 %v1402_v35, %v3139_v42 }
 0x414   : > { %2457 = vpow2.f32 %v1558_v46 }
 0x415   : > { %2459 = vpow2.f32 %v1560_v25 }
 0x416   : > { %2461 = vpow2.f32 %v1613_v50 }
 0x417   : > { %v2438_v7 = vpop.eup %2437 }
 0x418   : > { %v2440_v11 = vpop.eup %2439  ;;  %v1287_v13 = vmul.f32 0.0, %v2438_v7  ;;  %v1615_v7 = vmul.f32 1.442695, %v1612_v28 }
 0x419   : > { %v1288_v36 = vmul.f32 0.0, %v2440_v11  ;;  %v2442_v22 = vpop.eup %2441  ;;  %v1513_v11 = vmul.f32 %v1512_v43, %v3145_v52  ;;  %v1459_v52 = vmul.f32 %v1457_v4, %v3143_v48 }
 0x41a   : > { %v1295_v20 = vadd.f32 %v1293_v14, %v1287_v13  ;;  %v2444_v26 = vpop.eup %2443  ;;  %v1668_v13 = vmul.f32 1.442695, %v1666_v33  ;;  %2463 = vpow2.f32 %v1615_v7 }
 0x41b   : > { %v1296_v24 = vadd.f32 %v1294_v17, %v1288_v36  ;;  %v2446_v51 = vpop.eup %2445  ;;  %v1670_v17 = vmul.f32 1.442695, %v1667_v37 }
 0x41c   : > { %v1342_v31 = vmul.f32 %v2442_v22, %v1295_v20  ;;  %v2448_v56 = vpop.eup %2447  ;;  %v1297_v41 = vmul.f32 %v1295_v20, %v3182_v23  ;;  %2465 = vpow2.f32 %v1668_v13 }
 0x41d   : > { %v1343_v29 = vmul.f32 %v2444_v26, %v1296_v24  ;;  %v2450_v14 = vpop.eup %2449  ;;  %v1298_v42 = vmul.f32 %v1296_v24, %v3187_v30  ;;  %v1493_v26 = vpop.xlane.xlu0 %1492  ;;  %2467 = vpow2.f32 %v1670_v17 }
 0x41e   : > { %v1350_v49 = vadd.f32 %v1348_v27, %v1342_v31  ;;  %v2452_v39 = vpop.eup %2451  ;;  %v1299_v24 = vsel %vm837_vm3, %v1297_v41, 0.0 }
 0x41f   : > { %v1351_v55 = vadd.f32 %v1349_v40, %v1343_v29  ;;  %v2454_v31 = vpop.eup %2453  ;;  %v2111_v40 = vmul.f32 -1.442695, %v2831_v45 }
 0x420   : > { %v1397_v60 = vmul.f32 %v2446_v51, %v1350_v49  ;;  %v1352_v36 = vmul.f32 %v1350_v49, %v1328_v53  ;;  %v1514_v53 = vmul.f32 %v1512_v43, %v3147_v57  ;;  %v2456_v30 = vpop.eup %2455 }
 0x421   : > { %v1398_v44 = vmul.f32 %v2448_v56, %v1351_v55  ;;  %v1353_v15 = vmul.f32 %v1351_v55, %v1331_v58  ;;  %v1567_v58 = vrot.slane %v3189_v34, %v2997_v61  ;;  %v1300_v61 = vsel %vm837_vm3, %v1298_v42, 0.0  ;;  %v2458_v50 = vpop.eup %2457  ;;  %v1548_v7 = vpop.xlane.xlu0 %1547 }
 0x422   : > { %v1405_v10 = vadd.f32 %v1403_v38, %v1397_v60  ;;  %v2460_v56 = vpop.eup %2459  ;;  %v1301_v60 = vadd.f32 %v1300_v61, %v1299_v24  ;;  %2469 = vpow2.f32 %v2111_v40 }
 0x423   : > { %v1406_v3 = vadd.f32 %v1404_v9, %v1398_v44  ;;  %v1355_v23 = vsel %vm837_vm3, %v1353_v15, 0.0  ;;  %v1568_v49 = vmul.f32 %v1567_v58, %v3149_v62  ;;  %v1569_v44 = vmul.f32 %v1567_v58, %v3152_v63 }
 0x424   : > { %v1407_v46 = vmul.f32 %v1405_v10, %v1383_v19  ;;  %v1452_v21 = vmul.f32 %v2450_v14, %v1405_v10  ;;  %v1354_v19 = vsel %vm837_vm3, %v1352_v36, 0.0  ;;  %v2462_v14 = vpop.eup %2461  ;;  %v1677_v63 = vrot.slane %v3189_v34, %v3015_v12 }
 0x425   : > { %v1408_v47 = vmul.f32 %v1406_v3, %v1386_v32  ;;  %v1453_v22 = vmul.f32 %v2452_v39, %v1406_v3  ;;  %v1496_v32 = vpop.xlane.xlu1 %1495  ;;  %v1356_v4 = vadd.f32 %v1355_v23, %v1354_v19  ;;  %v1302_v39 = vrot.slane %v1301_v60, 4 }
 0x426   : > { %v1460_v25 = vadd.f32 %v1458_v54, %v1452_v21  ;;  %v1409_v48 = vsel %vm837_vm3, %v1407_v46, 0.0  ;;  %v1679_v40 = vmul.f32 %v1677_v63, %v3177_v18 }
 0x427   : > { %v1461_v20 = vadd.f32 %v1459_v52, %v1453_v22  ;;  %v1410_v27 = vsel %vm837_vm3, %v1408_v47, 0.0  ;;  %v2464_v46 = vpop.eup %2463 }
 0x428   : > { %v1507_v35 = vmul.f32 %v2454_v31, %v1460_v25  ;;  %v1462_v57 = vmul.f32 %v1460_v25, %v1438_v59  ;;  %v1411_v33 = vadd.f32 %v1410_v27, %v1409_v48  ;;  %v1622_v59 = vrot.slane %v3189_v34, %v3006_v5 }
 0x429   : > { %v1463_v28 = vmul.f32 %v1461_v20, %v1441_v1  ;;  %v1508_v29 = vmul.f32 %v2456_v30, %v1461_v20  ;;  %v1551_v13 = vpop.xlane.xlu1 %1550  ;;  %v2466_v31 = vpop.eup %2465  ;;  %v1303_v34 = vadd.f32 %v1302_v39, %v1301_v60 }
 0x42a   : > { %v1515_v43 = vadd.f32 %v1513_v11, %v1507_v35  ;;  %v1464_v51 = vsel %vm837_vm3, %v1462_v57, 0.0  ;;  %v1357_v11 = vrot.slane %v1356_v4, 4  ;;  %v1412_v15 = vrot.slane %v1411_v33, 4  ;;  %v2468_v12 = vpop.eup %2467 }
 0x42b   : > { %v1465_v55 = vsel %vm837_vm3, %v1463_v28, 0.0  ;;  %v1516_v37 = vadd.f32 %v1514_v53, %v1508_v29  ;;  %v1623_v47 = vmul.f32 %v1622_v59, %v3154_v0  ;;  %v1624_v53 = vmul.f32 %v1622_v59, %v3166_v6 }
 0x42c   : > { %v1517_v38 = vmul.f32 %v1515_v43, %v1493_v26  ;;  %v1466_v9 = vadd.f32 %v1465_v55, %v1464_v51  ;;  %v1562_v54 = vmul.f32 %v2458_v50, %v1515_v43  ;;  %v1358_v52 = vadd.f32 %v1357_v11, %v1356_v4  ;;  %v1603_v26 = vpop.xlane.xlu0 %1602 }
 0x42d   : > { %v1518_v10 = vmul.f32 %v1516_v37, %v1496_v32  ;;  %v1563_v62 = vmul.f32 %v2460_v56, %v1516_v37  ;;  %v1413_v23 = vadd.f32 %v1412_v15, %v1411_v33  ;;  %v1606_v0 = vpop.xlane.xlu1 %1605  ;;  %v1678_v57 = vmul.f32 %v1677_v63, %v3175_v16 }
 0x42e   : > { %v1519_v1 = vsel %vm837_vm3, %v1517_v38, 0.0  ;;  %v1570_v3 = vadd.f32 %v1568_v49, %v1562_v54  ;;  %v1467_v41 = vrot.slane %v1466_v9, 4  ;;  %v1359_v28 = vrot.slane %v1358_v52, 2 }
 0x42f   : > { %v1520_v36 = vsel %vm837_vm3, %v1518_v10, 0.0  ;;  %v1571_v17 = vadd.f32 %v1569_v44, %v1563_v62  ;;  %v1414_v4 = vrot.slane %v1413_v23, 2  ;;  %v1304_v33 = vrot.slane %v1303_v34, 2  ;;  %v2470_v54 = vpop.eup %2469 }
 0x430   : > { %v1521_v5 = vadd.f32 %v1520_v36, %v1519_v1  ;;  %v1572_v21 = vmul.f32 %v1570_v3, %v1548_v7  ;;  %v1617_v42 = vmul.f32 %v2462_v14, %v1570_v3  ;;  %v1468_v24 = vadd.f32 %v1467_v41, %v1466_v9  ;;  %v1658_v37 = vpop.xlane.xlu0 %1657 }
 0x431   : > { %v1573_v22 = vmul.f32 %v1571_v17, %v1551_v13  ;;  %v1618_v58 = vmul.f32 %v2464_v46, %v1571_v17  ;;  %v1360_v59 = vadd.f32 %v1359_v28, %v1358_v52  ;;  %v1661_v9 = vpop.xlane.xlu1 %1660  ;;  %v1415_v18 = vadd.f32 %v1414_v4, %v1413_v23 }
 0x432   : > { %v1522_v25 = vrot.slane %v1521_v5, 4  ;;  %v1574_v19 = vsel %vm837_vm3, %v1572_v21, 0.0  ;;  %v1625_v20 = vadd.f32 %v1623_v47, %v1617_v42  ;;  %v1469_v51 = vrot.slane %v1468_v24, 2 }
 0x433   : > { %v1575_v30 = vsel %vm837_vm3, %v1573_v22, 0.0  ;;  %v1626_v27 = vadd.f32 %v1624_v53, %v1618_v58  ;;  %v1305_v1 = vadd.f32 %v1304_v33, %v1303_v34  ;;  %v1361_v36 = vrot.slane %v1360_v59, 1 }
 0x434   : > { %v1576_v48 = vadd.f32 %v1575_v30, %v1574_v19  ;;  %v1523_v35 = vadd.f32 %v1522_v25, %v1521_v5  ;;  %v1627_v32 = vmul.f32 %v1625_v20, %v1603_v26  ;;  %v1672_v61 = vmul.f32 %v2466_v31, %v1625_v20 }
 0x435   : > { %v1628_v29 = vmul.f32 %v1626_v27, %v1606_v0  ;;  %v1673_v50 = vmul.f32 %v2468_v12, %v1626_v27  ;;  %v1470_v13 = vadd.f32 %v1469_v51, %v1468_v24  ;;  %v1416_v41 = vrot.slane %v1415_v18, 1  ;;  %v2475_v51 = vld [vmem:[%s2704_s4] sm:$0xff]  ;;  %s2031_s4 = sshll.u32 %s647_s23, 4  ;;  %s2032_s4 = int_to_ptr.vmem [resolvable:$true] %s2031_s4 }
 0x436   : > { %v1577_v6 = vrot.slane %v1576_v48, 4  ;;  %v1629_v43 = vsel %vm837_vm3, %v1627_v32, 0.0  ;;  %v1680_v49 = vadd.f32 %v1678_v57, %v1672_v61  ;;  %v1524_v60 = vrot.slane %v1523_v35, 2  ;;  %s2476_s7 = scalar_lea.vmem %s2032_s4, 128  ;;  %p2483_p0 = scmp.lt.s32.totalorder %s2032_s4, %s2481_s27 }
 0x437   : > { %v1630_v56 = vsel %vm837_vm3, %v1628_v29, 0.0  ;;  %v1681_v16 = vadd.f32 %v1679_v40, %v1673_v50  ;;  %v1306_v63 = vrot.slane %v1305_v1, 1  ;;  %v1471_v46 = vrot.slane %v1470_v13, 1  ;;  %p2477_p11 = scmp.ne.s32.totalorder %s2032_s4, %s2476_s7  ;;  %p2484_p1 = scmp.lt.s32.totalorder %s2482_s28, %s2476_s7 }
 0x438   : > { %v1578_v55 = vadd.f32 %v1577_v6, %v1576_v48  ;;  %v1682_v38 = vmul.f32 %v1680_v49, %v1658_v37  ;;  %v1631_v7 = vadd.f32 %v1630_v56, %v1629_v43  ;;  %v1525_v14 = vadd.f32 %v1524_v60, %v1523_v35  ;;  %v2110_v6 = vld [vmem:[%s3409_s13] ss:$0 sm:$0xff] }
 0x439   : > { %v1683_v11 = vmul.f32 %v1681_v16, %v1661_v9  ;;  %v1721_v42 = vadd.f32 1.0, %v2470_v54  ;;  %v1362_v52 = vadd.f32 %v1361_v36, %v1360_v59  ;;  %v1417_v58 = vadd.f32 %v1416_v41, %v1415_v18  ;;  %v1840_v16 = vld [vmem:[%s3413_s17 + $0x18] sm:$0xff]  ;;  %v1839_v59 = vld [vmem:[%s3413_s17 + $0x10] sm:$0xff]  ;;  %v1837_v9 = vld [vmem:[%s3413_s17] sm:$0xff]  ;;  %p2478_p12 = pnand %p2477_p11, %p2689_p5  ;;  %p2485_p2 = por %p2484_p1, %p2483_p0 }
 0x43a   : > { %v1579_v44 = vrot.slane %v1578_v55, 2  ;;  %v1684_v10 = vsel %vm837_vm3, %v1682_v38, 0.0  ;;  %v1632_v62 = vrot.slane %v1631_v7, 4  ;;  %v1526_v47 = vrot.slane %v1525_v14, 1  ;;  %v1937_v54 = vld [vmem:[%s3415_s19 + $0x78] sm:$0xff]  ;;  %v1936_v18 = vld [vmem:[%s3415_s19 + $0x70] sm:$0xff] }
 0x43b   : > { %v1685_v3 = vsel %vm837_vm3, %v1683_v11, 0.0  ;;  %v1307_v31 = vadd.f32 %v1306_v63, %v1305_v1  ;;  %v1472_v23 = vadd.f32 %v1471_v46, %v1470_v13  ;;  %2471 = vrcp.f32 %v1721_v42  ;;  %2352 = vmatpush3.msra.mxu1 %v1937_v54  ;;  %v1933_v11 = vld [vmem:[%s3415_s19 + $0x58] sm:$0xff]  ;;  %v1932_v1 = vld [vmem:[%s3415_s19 + $0x50] sm:$0xff]  ;;  %v1931_v13 = vld [vmem:[%s3415_s19 + $0x48] sm:$0xff]  ;;  %p2479_p13 = pneg %p2478_p12 }
 0x43c   : > { %v1633_v15 = vadd.f32 %v1632_v62, %v1631_v7  ;;  %v1580_v17 = vadd.f32 %v1579_v44, %v1578_v55  ;;  %v1686_v39 = vadd.f32 %v1685_v3, %v1684_v10  ;;  %v1527_v20 = vadd.f32 %v1526_v47, %v1525_v14  ;;  %v1838_v44 = vld [vmem:[%s3413_s17 + $0x8] sm:$0xff]  ;;  %2353 = vmatprep.subr.mxu1 %v2538_v8  ;;  %v1934_v62 = vld [vmem:[%s3415_s19 + $0x60] sm:$0xff]  ;;  %v1928_v3 = vld [vmem:[%s3415_s19 + $0x30] sm:$0xff] }
 0x43d   : > { %v1694_v30 = vsel %vm1693_vm9, %v1307_v31, %v1362_v52  ;;  %v1716_v40 = vmul.f32 %v2110_v6, %v2842_v2  ;;  %v1935_v10 = vld [vmem:[%s3415_s19 + $0x68] sm:$0xff]  ;;  %2354 = vmatpush3.msra.mxu1 %v1936_v18  ;;  %v1930_v14 = vld [vmem:[%s3415_s19 + $0x40] sm:$0xff]  ;;  %p2486_p3 = pnand %p2485_p2, %p2479_p13 }
 0x43e   : > { %v1634_v5 = vrot.slane %v1633_v15, 2  ;;  %v1687_v21 = vrot.slane %v1686_v39, 4  ;;  %v1581_v25 = vrot.slane %v1580_v17, 1  ;;  %v1696_v24 = vsel %vm1695_vm10, %v1694_v30, %v1417_v58  ;;  %2355 = vmatprep.subr.mxu1 %v2538_v8  ;;  %v1927_v36 = vld [vmem:[%s3415_s19 + $0x28] sm:$0xff]  ;;  %v2114_v47 = vld [vmem:[%s3412_s16] ss:$0 sm:$0xff] }
 0x43f   : > { %v1698_v27 = vsel %vm1697_vm11, %v1696_v24, %v1472_v23  ;;  %2356 = vmatpush3.msra.mxu1 %v1935_v10  ;;  %v1922_v58 = vld [vmem:[%s3415_s19] sm:$0xff] }
 0x440   : > { %v1635_v22 = vadd.f32 %v1634_v5, %v1633_v15  ;;  %v1688_v26 = vadd.f32 %v1687_v21, %v1686_v39  ;;  %v1582_v12 = vadd.f32 %v1581_v25, %v1580_v17  ;;  %v1700_v35 = vsel %vm1699_vm12, %v1698_v27, %v1527_v20  ;;  %2357 = vmatprep.subr.mxu1 %v2538_v8  ;;  %v1929_v15 = vld [vmem:[%s3415_s19 + $0x38] sm:$0xff]  ;;  %v1926_v17 = vld [vmem:[%s3415_s19 + $0x20] sm:$0xff]  ;;  %v1924_v25 = vld [vmem:[%s3415_s19 + $0x10] sm:$0xff] }
 0x441   : > { %2358 = vmatpush3.msra.mxu1 %v1934_v62  ;;  %v1925_v39 = vld [vmem:[%s3415_s19 + $0x18] sm:$0xff]  ;;  %v2113_v21 = vld [vmem:[%s3411_s15] ss:$0 sm:$0xff] }
 0x442   : > { %v1636_v53 = vrot.slane %v1635_v22, 1  ;;  %v1689_v19 = vrot.slane %v1688_v26, 2  ;;  %v1702_v32 = vsel %vm1701_vm13, %v1700_v35, %v1582_v12  ;;  %2359 = vmatprep.subr.mxu1 %v2538_v8  ;;  %v2117_v30 = vld [vmem:[%s3416_s20] ss:$0 sm:$0xff] }
 0x443   : > { %2360 = vmatpush3.msra.mxu1 %v1933_v11 }
 0x444   : > { %v1690_v34 = vadd.f32 %v1689_v19, %v1688_v26  ;;  %v1637_v48 = vadd.f32 %v1636_v53, %v1635_v22  ;;  %2361 = vmatprep.subr.mxu1 %v2538_v8  ;;  %v1923_v26 = vld [vmem:[%s3415_s19 + $0x8] sm:$0xff]  ;;  %v2115_v53 = vld [vmem:[%s3414_s18] ss:$0 sm:$0xff] }
 0x445   : > { %2362 = vmatpush3.msra.mxu1 %v1932_v1 }
 0x446   : > { %v1691_v0 = vrot.slane %v1690_v34, 1  ;;  %v1704_v57 = vsel %vm1703_vm14, %v1702_v32, %v1637_v48  ;;  %2363 = vmatprep.subr.mxu1 %v2538_v8 }
 0x447   : > { %2364 = vmatpush3.msra.mxu1 %v1931_v13 }
 0x448   : > { %v1692_v61 = vadd.f32 %v1691_v0, %v1690_v34  ;;  %v2472_v29 = vpop.eup %2471  ;;  %2365 = vmatprep.subr.mxu1 %v2538_v8 }
 0x449   : > { %v1724_v43 = vmul.f32 %v2472_v29, %v2831_v45  ;;  %2366 = vmatpush3.msra.mxu1 %v1930_v14 }
 0x44a   : > { %v1706_v28 = vsel %vm1705_vm15, %v1704_v57, %v1692_v61  ;;  %2367 = vmatprep.subr.mxu1 %v2538_v8 }
 0x44b   : > { %1707 = vst.msk [vmem:[#allocation5] sm:$0xff] %vm837_vm3, %v1706_v28  ;;  %2368 = vmatpush3.msra.mxu1 %v1929_v15 }
 0x44c   : > { %2369 = vmatprep.subr.mxu1 %v2538_v8 }
 0x44d   : > { %2370 = vmatpush3.msra.mxu1 %v1928_v3 }
 0x44e   : > { %2371 = vmatprep.subr.mxu1 %v2538_v8 }
 0x44f   : > { %2372 = vmatpush3.msra.mxu1 %v1927_v36 }
 0x450   : > { %2373 = vmatprep.subr.mxu1 %v2538_v8 }
 0x451   : > { %2374 = vmatpush3.msra.mxu1 %v1926_v17 }
 0x452   : > { %v1708_v4 = vld [vmem:[#allocation5] sm:$0xff]  ;;  %2375 = vmatprep.subr.mxu1 %v2538_v8 }
 0x453   : > { %v1717_v49 = vadd.f32 %v1716_v40, %v1708_v4  ;;  %2376 = vmatpush3.msra.mxu1 %v1925_v39 }
 0x454   : > { %2377 = vmatprep.subr.mxu1 %v2538_v8 }
 0x455   : > { %v1725_v50 = vmul.f32 %v1724_v43, %v1717_v49  ;;  %2378 = vmatpush3.msra.mxu1 %v1924_v25 }
 0x456   : > { %2379 = vmatprep.subr.mxu1 %v2538_v8 }
 0x457   : > { %2338 = vmatmul.mubr.msk.f32.vlgmr.msra.gmra.mxu0 %vm837_vm3, %v1725_v50  ;;  %2380 = vmatpush3.msra.mxu1 %v1923_v26 }
 0x458   : > { %2348 = vmatprep.mubr.msk.f32.mxu0 %vm2539_vm1, %v2538_v8  ;;  %2341 = vmatpush3.msra.mxu0 %v1840_v16 }
 0x459   : > { %2342 = vmatprep.subr.mxu0 %v2538_v8  ;;  %2381 = vmatprep.subr.mxu1 %v2538_v8 }
 0x45a   : > { %2343 = vmatpush3.msra.mxu0 %v1839_v59  ;;  %2382 = vmatpush3.msra.mxu1 %v1922_v58 }
 0x45b   : > { %2344 = vmatprep.subr.mxu0 %v2538_v8 }
 0x45c   : > { %2345 = vmatpush3.msra.mxu0 %v1838_v44 }
 0x45d   : > { %2346 = vmatprep.subr.mxu0 %v2538_v8 }
 0x45e   : > { %2347 = vmatpush3.msra.mxu0 %v1837_v9 }
 0x517   : > { %v1803_v33 = vpop.f32.mrf.mxu0 }
 0x518   : > { %v3263_v55 = vadd.f32 %v2475_v51, %v1803_v33 }
 0x519   : > { %v2339_v37 = vpop.f32.mrf.mxu0 }
 0x51a   : > { %v1810_v56 = vsel %vm655_vm0, %v3263_v55, 0.0 }
 0x51b   : > { %1811 = vadd.xlane.f32.xlu0 %v1810_v56 }
 0x5a4   : > { %v1812_v2 = vpop.xlane.xlu0 %1811 }
 0x5a5   : > { %v1813_v60 = vmul.f32 0.03125, %v1812_v2 }
 0x5a7   : > { %v1814_v45 = vsub.f32 %v3263_v55, %v1813_v60 }
 0x5a9   : > { %v1815_v38 = vmul.f32 %v1814_v45, %v1814_v45 }
 0x5ab   : > { %v1816_v7 = vsel %vm655_vm0, %v1815_v38, 0.0 }
 0x5ac   : > { %1817 = vadd.xlane.f32.xlu1 %v1816_v7 }
 0x635   : > { %v1818_v41 = vpop.xlane.xlu1 %1817 }
 0x636   : > { %v1819_v5 = vmul.f32 0.03125, %v1818_v41 }
 0x638   : > { %v1820_v63 = vadd.f32 1e-05, %v1819_v5 }
 0x63a   : > { %2473 = vrsqrt.f32 %v1820_v63 }
 0x647   : > { %v2474_v46 = vpop.eup %2473 }
 0x648   : > { %v1822_v42 = vmul.f32 %v2474_v46, %v1814_v45 }
 0x64a   : > { %v1829_v22 = vmul.f32 %v2113_v21, %v1822_v42 }
 0x64c   : > { %v1836_v52 = vadd.f32 %v2114_v47, %v1829_v22 }
 0x64e   : > { %2349 = vmatmul.mubr.msk.f32.vlgmr.msra.gmra.mxu0 %vm655_vm0, %v1836_v52 }
 0x70e   : > { %v1917_v31 = vpop.f32.mrf.mxu0 }
 0x70f   : > { %v1918_v23 = vadd.f32 %v2115_v53, %v1917_v31 }
 0x710   : > { %v2350_v19 = vpop.f32.mrf.mxu0 }
 0x711   : > { %v1921_v20 = vmax.f32 %v1918_v23, 0.0 }
 0x713   : > { %2384 = vmatmul.mubr.f32.vlgmr.msra.gmra.mxu1 %v1921_v20 }
 0x7d3   : > { %v2011_v12 = vpop.f32.mrf.mxu1 }
 0x7d4   : > { %v2012_v8 = vadd.f32 %v2117_v30, %v2011_v12 }
 0x7d5   : > { %v2385_v34 = vpop.f32.mrf.mxu1 }
 0x7d6   : > { %v2015_v24 = vadd.f32 %v2012_v8, %v3263_v55 }
 0x7d8   : > { %2016 = vst.msk [vmem:[%s647_s23] sm:$0xff] %vm655_vm0, %v2015_v24 }
 0x7d9   : > { %2489 = shalt.err (!%p2486_p3)
}
 0x7da   : > { %s2490_s0 = scalar_lea.hbm %s2029_s24, 128  ;;  %s2494_s23 = scalar_lea.hbm %s3417_s21, 256 }
 0x7db   : > { %p2491_p4 = scmp.ne.s32.totalorder %s2029_s24, %s2490_s0  ;;  %p2495_p9 = scmp.lt.s32.totalorder %s2029_s24, %s3417_s21 }
 0x7dc   : > { %p2496_p10 = scmp.lt.s32.totalorder %s2494_s23, %s2490_s0 }
 0x7dd   : > { %p2492_p7 = pnand %p2491_p4, %p2689_p5 }
 0x7de   : > { %p2497_p11 = por %p2496_p10, %p2495_p9 }
 0x7df   : > { %p2493_p8 = pneg %p2492_p7 }
 0x7e1   : > { %p2498_p12 = pnand %p2497_p11, %p2493_p8 }
 0x7e3   : > { %2501 = shalt.err (!%p2498_p12)
}
 0x7e4   : > { %2386 = dma.vmem_to_hbm [thread:$0]  (%p2689_p5), %s2032_s4, 128, %s2029_s24, %s2018_s6  }
 0x7e5 PF: > { %s3458_s7 = sld [smem:[#allocation13_spill]] }
 0x7e6   : > { %s3459_s3 = sld [smem:[#allocation11_spill]] }
 0x7eb   : > { %p2392_p13 = scmp.ge.s32.totalorder %s3458_s7, 2 }
 0x7ec   : > { %s2043_s28 = sand.u32 1, %s3459_s3  }
 0x7ed   : > { %p2389_p0 = pnand %p2392_p13, %p2693_p6  ;;  %s2044_s2 = scalar_lea.sflag [#allocation9], %s2043_s28 }
 0x7ef   : > { %p2390_p1 = pneg %p2389_p0 }
 0x7f1   : > { %2519 = dma.done.wait (%p2390_p1), %s2044_s2, 128  }
 0x7f2   : > { %2521 = vsyncadd (%p2390_p1), %s2044_s2, 4294967168  ;;  %s3461_s27 = sld [smem:[#allocation14_spill]]  ;;  %s3464_s2 = smov %s2528_s25 }
 0x7f3   : > { %s3462_s0 = sld [smem:[#allocation12_spill]] }
 0x7f4   : > { %s3463_s26 = sld [smem:[#allocation15_spill]] }
 0x7f8   : > { %p31_p2 = scmp.ge.s32.totalorder %s3461_s27, 4  }
 0x7f9   : > { %s3465_s25 = smov %s3462_s0 }
 0x7fa   :  { %33 = sbr.rel (!%p31_p2) target bundleno = 12 (0xc), region = 139 }
 0x7ff   :  { %2049 = vsyncpa [#allocation9], 1 }
 0x800   :  { %2051 = vsyncpa [#allocation9 + $0x1], 1 }

</bundles_post_ra>
